<compile_context>
chip_gen: v7x
topology: tpu7x:2x2x1
jax: 0.10.0
libtpu: 0.0.40
codegen_flags: <defaults>
</compile_context>

<pallas_src>
import math

import jax
import jax.numpy as jnp
import numpy as np
from jax.experimental import pallas as pl
from jax.experimental.pallas import tpu as pltpu


# ----------------------------------------------------------------------------
# Pallas kernel: fused SinPosEmb(x3) -> Linear(3E -> H) -> Mish -> Linear(H -> E)
# ----------------------------------------------------------------------------
def _encoder_kernel(t1_ref, t2_ref, t3_ref, freqs_ref,
                    w1_ref, b1_ref, w2_ref, b2_ref, o_ref):
    half = freqs_ref.shape[1]
    E = 2 * half
    freqs = freqs_ref[...]                                       # (1, half) f32

    def dot_bf16(x_f32, w_bf16):
        # bf16 MXU operands, f32 accumulation.
        return jnp.dot(x_f32.astype(jnp.bfloat16), w_bf16,
                       preferred_element_type=jnp.float32)

    # Sinusoidal embedding fused with the first Linear.  For each timestep i:
    #   temb_i @ W1_i == sin(args_i) @ W1_i[:half, :] + cos(args_i) @ W1_i[half:, :]
    # so the (B, 3E) concat never materializes; sin/cos go straight from the
    # EUP into the MXU via six K=half passes accumulated in f32.
    h = b1_ref[...]                                              # (1, H) f32 bias
    for k, t_ref in enumerate((t1_ref, t2_ref, t3_ref)):
        args = t_ref[...] * freqs                                # (B, half) f32
        base = k * E
        h = h + dot_bf16(jnp.sin(args), w1_ref[base:base + half, :])
        h = h + dot_bf16(jnp.cos(args), w1_ref[base + half:base + E, :])

    # Mish = h * tanh(softplus(h)), rewritten with a single exp:
    #   tanh(softplus(h)) = ((1 + e)^2 - 1) / ((1 + e)^2 + 1),  e = exp(h)
    # Clamp h at 20 inside the exp (tanh(softplus(h)) == 1 to f32 precision
    # beyond that), keeping the outer multiply on the unclamped h.
    e = jnp.exp(jnp.minimum(h, 20.0))
    n = (1.0 + e) * (1.0 + e)
    h = h * ((n - 1.0) * pl.reciprocal(n + 1.0, approx=True))

    # Second linear, bf16 MXU with f32 accumulation; lane-dense f32 store.
    y = jnp.dot(h.astype(jnp.bfloat16), w2_ref[...],
                preferred_element_type=jnp.float32)
    o_ref[...] = y + b2_ref[...]


# ----------------------------------------------------------------------------
# Param prep (done ONCE, outside jit) and JAX wrapper
# ----------------------------------------------------------------------------
def sinusoidal_freqs(embed_dim):
    half = embed_dim // 2
    assert embed_dim % 2 == 0 and half > 1, "embed_dim must be even and >= 4"
    return jnp.exp(jnp.arange(half, dtype=jnp.float32)
                   * (-math.log(10000.0) / (half - 1))).reshape(1, half)


def prepare_kernel_params(params, embed_dim):
    """Cast weights to bf16 / reshape biases ONCE (keep f32 masters elsewhere)."""
    H = params["w1"].shape[1]
    E = params["w2"].shape[1]
    return {
        "w1": params["w1"].astype(jnp.bfloat16),                 # (3E, H)
        "b1": params["b1"].reshape(1, H).astype(jnp.float32),
        "w2": params["w2"].astype(jnp.bfloat16),                 # (H, E)
        "b2": params["b2"].reshape(1, E).astype(jnp.float32),
        "freqs": sinusoidal_freqs(embed_dim),                    # (1, half) f32
    }


def triple_timestep_encoder(kparams, t1, t2, t3):
    w1, b1 = kparams["w1"], kparams["b1"]
    w2, b2 = kparams["w2"], kparams["b2"]
    freqs = kparams["freqs"]

    B = t1.shape[0]
    K3, H = w1.shape
    E = w2.shape[1]
    half = freqs.shape[1]

    t1f = t1.astype(jnp.float32).reshape(B, 1)
    t2f = t2.astype(jnp.float32).reshape(B, 1)
    t3f = t3.astype(jnp.float32).reshape(B, 1)

    def full(shape):
        return pl.BlockSpec(shape, lambda i: (0,) * len(shape))

    return pl.pallas_call(
        _encoder_kernel,
        out_shape=jax.ShapeDtypeStruct((B, E), jnp.float32),
        grid=(1,),
        in_specs=[
            full((B, 1)), full((B, 1)), full((B, 1)),            # timesteps
            full((1, half)),                                      # freqs
            full((K3, H)), full((1, H)),                          # Linear 1
            full((H, E)), full((1, E)),                           # Linear 2
        ],
        out_specs=full((B, E)),
        compiler_params=pltpu.CompilerParams(
            dimension_semantics=("arbitrary",)),
    )(t1f, t2f, t3f, freqs, w1, b1, w2, b2)


def reference(params, t1, t2, t3, embed_dim):
    """Pure-JAX f32 reference of the PyTorch forward."""
    half = embed_dim // 2
    freqs = jnp.exp(jnp.arange(half, dtype=jnp.float32)
                    * (-math.log(10000.0) / (half - 1)))

    def emb(t):
        args = t.astype(jnp.float32)[:, None] * freqs[None, :]
        return jnp.concatenate([jnp.sin(args), jnp.cos(args)], axis=-1)

    temb = jnp.concatenate([emb(t1), emb(t2), emb(t3)], axis=-1)
    h = temb @ params["w1"] + params["b1"]
    h = h * jnp.tanh(jax.nn.softplus(h))
    return h @ params["w2"] + params["b2"]


# ----------------------------------------------------------------------------
# Main
# ----------------------------------------------------------------------------
if __name__ == "__main__":
    embed_dim = 128            # lane-dense small demo size (half = 64)
    mlp_ratio = 4.0
    hidden_dim = int(embed_dim * mlp_ratio)    # 512
    B = 16                     # multiple of 16 -> bf16 sublane packing on M

    key = jax.random.PRNGKey(0)
    kw1, kb1, kw2, kb2, kt1, kt2, kt3 = jax.random.split(key, 7)
    params = {
        "w1": jax.random.normal(kw1, (3 * embed_dim, hidden_dim), jnp.float32) * 0.02,
        "b1": jax.random.normal(kb1, (hidden_dim,), jnp.float32) * 0.02,
        "w2": jax.random.normal(kw2, (hidden_dim, embed_dim), jnp.float32) * 0.02,
        "b2": jax.random.normal(kb2, (embed_dim,), jnp.float32) * 0.02,
    }
    t1 = jax.random.randint(kt1, (B,), 0, 1000).astype(jnp.int32)
    t2 = jax.random.randint(kt2, (B,), 0, 1000).astype(jnp.int32)
    t3 = jax.random.randint(kt3, (B,), 0, 1000).astype(jnp.int32)

    # bf16 weight cast + bias reshape + freq table built ONCE, outside jit.
    kparams = prepare_kernel_params(params, embed_dim)

    encode = jax.jit(triple_timestep_encoder)
    out = encode(kparams, t1, t2, t3)
    jax.block_until_ready(out)

    assert out.shape == (B, embed_dim)
    ref = reference(params, t1, t2, t3, embed_dim)
    np.testing.assert_allclose(np.asarray(out), np.asarray(ref),
                               rtol=2e-2, atol=2e-2)
    print("KERNEL_OK")
</pallas_src>

<mosaic_0001>
module attributes {stable_mosaic.version = 11 : i64} {
  func.func @_encoder_kernel(%arg0: i32, %arg1: memref<16x1xf32, #tpu.memory_space<vmem>>, %arg2: memref<16x1xf32, #tpu.memory_space<vmem>>, %arg3: memref<16x1xf32, #tpu.memory_space<vmem>>, %arg4: memref<1x64xf32, #tpu.memory_space<vmem>>, %arg5: memref<384x512xbf16, #tpu.memory_space<vmem>>, %arg6: memref<1x512xf32, #tpu.memory_space<vmem>>, %arg7: memref<512x128xbf16, #tpu.memory_space<vmem>>, %arg8: memref<1x128xf32, #tpu.memory_space<vmem>>, %arg9: memref<16x128xf32, #tpu.memory_space<vmem>>) attributes {dimension_semantics = [#tpu.dimension_semantics<arbitrary>], iteration_bounds = array<i64: 1>, scalar_prefetch = 0 : i64, scratch_operands = 0 : i64, tpu.core_type = #tpu.core_type<tc>, window_params = [{pipeline_mode = #tpu.pipeline_mode<synchronous>, transform_indices = @transform_0, window_bounds = array<i64: 16, 1>}, {pipeline_mode = #tpu.pipeline_mode<synchronous>, transform_indices = @transform_1, window_bounds = array<i64: 16, 1>}, {pipeline_mode = #tpu.pipeline_mode<synchronous>, transform_indices = @transform_2, window_bounds = array<i64: 16, 1>}, {pipeline_mode = #tpu.pipeline_mode<synchronous>, transform_indices = @transform_3, window_bounds = array<i64: 1, 64>}, {pipeline_mode = #tpu.pipeline_mode<synchronous>, transform_indices = @transform_4, window_bounds = array<i64: 384, 512>}, {pipeline_mode = #tpu.pipeline_mode<synchronous>, transform_indices = @transform_5, window_bounds = array<i64: 1, 512>}, {pipeline_mode = #tpu.pipeline_mode<synchronous>, transform_indices = @transform_6, window_bounds = array<i64: 512, 128>}, {pipeline_mode = #tpu.pipeline_mode<synchronous>, transform_indices = @transform_7, window_bounds = array<i64: 1, 128>}, {pipeline_mode = #tpu.pipeline_mode<synchronous>, transform_indices = @transform_8, window_bounds = array<i64: 16, 128>}]} {
    %c0 = arith.constant 0 : index
    %c0_0 = arith.constant 0 : index
    %0 = vector.load %arg4[%c0, %c0_0] : memref<1x64xf32, #tpu.memory_space<vmem>>, vector<1x64xf32>
    %c0_1 = arith.constant 0 : index
    %c0_2 = arith.constant 0 : index
    %1 = vector.load %arg6[%c0_1, %c0_2] : memref<1x512xf32, #tpu.memory_space<vmem>>, vector<1x512xf32>
    %c0_3 = arith.constant 0 : index
    %c0_4 = arith.constant 0 : index
    %2 = vector.load %arg1[%c0_3, %c0_4] : memref<16x1xf32, #tpu.memory_space<vmem>>, vector<16x1xf32>
    %3 = vector.broadcast %2 : vector<16x1xf32> to vector<16x64xf32>
    %4 = vector.broadcast %0 : vector<1x64xf32> to vector<16x64xf32>
    %5 = arith.mulf %3, %4 : vector<16x64xf32>
    %6 = math.sin %5 : vector<16x64xf32>
    %c0_5 = arith.constant 0 : index
    %c0_6 = arith.constant 0 : index
    %7 = vector.load %arg5[%c0_5, %c0_6] : memref<384x512xbf16, #tpu.memory_space<vmem>>, vector<64x512xbf16>
    %8 = arith.truncf %6 : vector<16x64xf32> to vector<16x64xbf16>
    %cst = arith.constant dense<0.000000e+00> : vector<16x512xf32>
    %9 = tpu.matmul %8, %7, %cst {dimension_numbers = #tpu.dot_dimension_numbers<[1], [0], [0], [1], [0, 0, 1, 1], [], []>} : vector<16x64xbf16>, vector<64x512xbf16>, vector<16x512xf32> -> vector<16x512xf32>
    %10 = vector.broadcast %1 : vector<1x512xf32> to vector<16x512xf32>
    %11 = arith.addf %10, %9 : vector<16x512xf32>
    %12 = math.cos %5 : vector<16x64xf32>
    %c64 = arith.constant 64 : index
    %c0_7 = arith.constant 0 : index
    %13 = vector.load %arg5[%c64, %c0_7] : memref<384x512xbf16, #tpu.memory_space<vmem>>, vector<64x512xbf16>
    %14 = arith.truncf %12 : vector<16x64xf32> to vector<16x64xbf16>
    %cst_8 = arith.constant dense<0.000000e+00> : vector<16x512xf32>
    %15 = tpu.matmul %14, %13, %cst_8 {dimension_numbers = #tpu.dot_dimension_numbers<[1], [0], [0], [1], [0, 0, 1, 1], [], []>} : vector<16x64xbf16>, vector<64x512xbf16>, vector<16x512xf32> -> vector<16x512xf32>
    %16 = arith.addf %11, %15 : vector<16x512xf32>
    %c0_9 = arith.constant 0 : index
    %c0_10 = arith.constant 0 : index
    %17 = vector.load %arg2[%c0_9, %c0_10] : memref<16x1xf32, #tpu.memory_space<vmem>>, vector<16x1xf32>
    %18 = vector.broadcast %17 : vector<16x1xf32> to vector<16x64xf32>
    %19 = vector.broadcast %0 : vector<1x64xf32> to vector<16x64xf32>
    %20 = arith.mulf %18, %19 : vector<16x64xf32>
    %21 = math.sin %20 : vector<16x64xf32>
    %c128 = arith.constant 128 : index
    %c0_11 = arith.constant 0 : index
    %22 = vector.load %arg5[%c128, %c0_11] : memref<384x512xbf16, #tpu.memory_space<vmem>>, vector<64x512xbf16>
    %23 = arith.truncf %21 : vector<16x64xf32> to vector<16x64xbf16>
    %cst_12 = arith.constant dense<0.000000e+00> : vector<16x512xf32>
    %24 = tpu.matmul %23, %22, %cst_12 {dimension_numbers = #tpu.dot_dimension_numbers<[1], [0], [0], [1], [0, 0, 1, 1], [], []>} : vector<16x64xbf16>, vector<64x512xbf16>, vector<16x512xf32> -> vector<16x512xf32>
    %25 = arith.addf %16, %24 : vector<16x512xf32>
    %26 = math.cos %20 : vector<16x64xf32>
    %c192 = arith.constant 192 : index
    %c0_13 = arith.constant 0 : index
    %27 = vector.load %arg5[%c192, %c0_13] : memref<384x512xbf16, #tpu.memory_space<vmem>>, vector<64x512xbf16>
    %28 = arith.truncf %26 : vector<16x64xf32> to vector<16x64xbf16>
    %cst_14 = arith.constant dense<0.000000e+00> : vector<16x512xf32>
    %29 = tpu.matmul %28, %27, %cst_14 {dimension_numbers = #tpu.dot_dimension_numbers<[1], [0], [0], [1], [0, 0, 1, 1], [], []>} : vector<16x64xbf16>, vector<64x512xbf16>, vector<16x512xf32> -> vector<16x512xf32>
    %30 = arith.addf %25, %29 : vector<16x512xf32>
    %c0_15 = arith.constant 0 : index
    %c0_16 = arith.constant 0 : index
    %31 = vector.load %arg3[%c0_15, %c0_16] : memref<16x1xf32, #tpu.memory_space<vmem>>, vector<16x1xf32>
    %32 = vector.broadcast %31 : vector<16x1xf32> to vector<16x64xf32>
    %33 = vector.broadcast %0 : vector<1x64xf32> to vector<16x64xf32>
    %34 = arith.mulf %32, %33 : vector<16x64xf32>
    %35 = math.sin %34 : vector<16x64xf32>
    %c256 = arith.constant 256 : index
    %c0_17 = arith.constant 0 : index
    %36 = vector.load %arg5[%c256, %c0_17] : memref<384x512xbf16, #tpu.memory_space<vmem>>, vector<64x512xbf16>
    %37 = arith.truncf %35 : vector<16x64xf32> to vector<16x64xbf16>
    %cst_18 = arith.constant dense<0.000000e+00> : vector<16x512xf32>
    %38 = tpu.matmul %37, %36, %cst_18 {dimension_numbers = #tpu.dot_dimension_numbers<[1], [0], [0], [1], [0, 0, 1, 1], [], []>} : vector<16x64xbf16>, vector<64x512xbf16>, vector<16x512xf32> -> vector<16x512xf32>
    %39 = arith.addf %30, %38 : vector<16x512xf32>
    %40 = math.cos %34 : vector<16x64xf32>
    %c320 = arith.constant 320 : index
    %c0_19 = arith.constant 0 : index
    %41 = vector.load %arg5[%c320, %c0_19] : memref<384x512xbf16, #tpu.memory_space<vmem>>, vector<64x512xbf16>
    %42 = arith.truncf %40 : vector<16x64xf32> to vector<16x64xbf16>
    %cst_20 = arith.constant dense<0.000000e+00> : vector<16x512xf32>
    %43 = tpu.matmul %42, %41, %cst_20 {dimension_numbers = #tpu.dot_dimension_numbers<[1], [0], [0], [1], [0, 0, 1, 1], [], []>} : vector<16x64xbf16>, vector<64x512xbf16>, vector<16x512xf32> -> vector<16x512xf32>
    %44 = arith.addf %39, %43 : vector<16x512xf32>
    %cst_21 = arith.constant 2.000000e+01 : f32
    %45 = vector.broadcast %cst_21 : f32 to vector<16x512xf32>
    %46 = arith.minimumf %44, %45 : vector<16x512xf32>
    %47 = math.exp %46 : vector<16x512xf32>
    %cst_22 = arith.constant 1.000000e+00 : f32
    %48 = vector.broadcast %cst_22 : f32 to vector<16x512xf32>
    %49 = arith.addf %48, %47 : vector<16x512xf32>
    %cst_23 = arith.constant 1.000000e+00 : f32
    %50 = vector.broadcast %cst_23 : f32 to vector<16x512xf32>
    %51 = arith.addf %50, %47 : vector<16x512xf32>
    %52 = arith.mulf %49, %51 : vector<16x512xf32>
    %cst_24 = arith.constant 1.000000e+00 : f32
    %53 = vector.broadcast %cst_24 : f32 to vector<16x512xf32>
    %54 = arith.subf %52, %53 : vector<16x512xf32>
    %cst_25 = arith.constant 1.000000e+00 : f32
    %55 = vector.broadcast %cst_25 : f32 to vector<16x512xf32>
    %56 = arith.addf %52, %55 : vector<16x512xf32>
    %57 = tpu.reciprocal %56 {approx = true} : vector<16x512xf32> -> vector<16x512xf32>
    %58 = arith.mulf %54, %57 : vector<16x512xf32>
    %59 = arith.mulf %44, %58 : vector<16x512xf32>
    %60 = arith.truncf %59 : vector<16x512xf32> to vector<16x512xbf16>
    %c0_26 = arith.constant 0 : index
    %c0_27 = arith.constant 0 : index
    %61 = vector.load %arg7[%c0_26, %c0_27] : memref<512x128xbf16, #tpu.memory_space<vmem>>, vector<512x128xbf16>
    %cst_28 = arith.constant dense<0.000000e+00> : vector<16x128xf32>
    %62 = tpu.matmul %60, %61, %cst_28 {dimension_numbers = #tpu.dot_dimension_numbers<[1], [0], [0], [1], [0, 0, 1, 1], [], []>} : vector<16x512xbf16>, vector<512x128xbf16>, vector<16x128xf32> -> vector<16x128xf32>
    %c0_29 = arith.constant 0 : index
    %c0_30 = arith.constant 0 : index
    %63 = vector.load %arg8[%c0_29, %c0_30] : memref<1x128xf32, #tpu.memory_space<vmem>>, vector<1x128xf32>
    %64 = vector.broadcast %63 : vector<1x128xf32> to vector<16x128xf32>
    %65 = arith.addf %62, %64 : vector<16x128xf32>
    %c0_31 = arith.constant 0 : index
    %c0_32 = arith.constant 0 : index
    %66 = vector.load %arg9[%c0_31, %c0_32] : memref<16x128xf32, #tpu.memory_space<vmem>>, vector<16x128xf32>
    tpu.vector_store %arg9[%c0_31, %c0_32], %65 {strides = array<i32>} : memref<16x128xf32, #tpu.memory_space<vmem>>, vector<16x128xf32>,
    return
  }
  func.func @transform_0(%arg0: i32) -> (i32, i32) {
    %c0_i32 = arith.constant 0 : i32
    %c0_i32_0 = arith.constant 0 : i32
    %c0_i32_1 = arith.constant 0 : i32
    return %c0_i32, %c0_i32_0 : i32, i32
  }
  func.func @transform_1(%arg0: i32) -> (i32, i32) {
    %c0_i32 = arith.constant 0 : i32
    %c0_i32_0 = arith.constant 0 : i32
    %c0_i32_1 = arith.constant 0 : i32
    return %c0_i32, %c0_i32_0 : i32, i32
  }
  func.func @transform_2(%arg0: i32) -> (i32, i32) {
    %c0_i32 = arith.constant 0 : i32
    %c0_i32_0 = arith.constant 0 : i32
    %c0_i32_1 = arith.constant 0 : i32
    return %c0_i32, %c0_i32_0 : i32, i32
  }
  func.func @transform_3(%arg0: i32) -> (i32, i32) {
    %c0_i32 = arith.constant 0 : i32
    %c0_i32_0 = arith.constant 0 : i32
    %c0_i32_1 = arith.constant 0 : i32
    return %c0_i32, %c0_i32_0 : i32, i32
  }
  func.func @transform_4(%arg0: i32) -> (i32, i32) {
    %c0_i32 = arith.constant 0 : i32
    %c0_i32_0 = arith.constant 0 : i32
    %c0_i32_1 = arith.constant 0 : i32
    return %c0_i32, %c0_i32_0 : i32, i32
  }
  func.func @transform_5(%arg0: i32) -> (i32, i32) {
    %c0_i32 = arith.constant 0 : i32
    %c0_i32_0 = arith.constant 0 : i32
    %c0_i32_1 = arith.constant 0 : i32
    return %c0_i32, %c0_i32_0 : i32, i32
  }
  func.func @transform_6(%arg0: i32) -> (i32, i32) {
    %c0_i32 = arith.constant 0 : i32
    %c0_i32_0 = arith.constant 0 : i32
    %c0_i32_1 = arith.constant 0 : i32
    return %c0_i32, %c0_i32_0 : i32, i32
  }
  func.func @transform_7(%arg0: i32) -> (i32, i32) {
    %c0_i32 = arith.constant 0 : i32
    %c0_i32_0 = arith.constant 0 : i32
    %c0_i32_1 = arith.constant 0 : i32
    return %c0_i32, %c0_i32_0 : i32, i32
  }
  func.func @transform_8(%arg0: i32) -> (i32, i32) {
    %c0_i32 = arith.constant 0 : i32
    %c0_i32_0 = arith.constant 0 : i32
    %c0_i32_1 = arith.constant 0 : i32
    return %c0_i32, %c0_i32_0 : i32, i32
  }
}

</mosaic_0001>

<bundles_post_ra>
// kernel: triple_timestep_encoder.1
= control target key start
LH: loop header
LB: loop body
LE: loop exit
PB: predicated region body
PF: predicated region fallthrough
CT: control target
= control target key end

     0   :  { %13 = vsyncpa [#allocation3], 0  ;;  %s4363_s0 = inlined_call_operand.vmem [shape: f32[16,1], index: 0, kind: input, shape index: {}]   ;;  %s4364_s1 = inlined_call_operand.vmem [shape: f32[16,1], index: 1, kind: input, shape index: {}]   ;;  %s4365_s2 = inlined_call_operand.vmem [shape: f32[16,1], index: 2, kind: input, shape index: {}]   ;;  %s4366_s3 = inlined_call_operand.vmem [shape: f32[1,64], index: 3, kind: input, shape index: {}]   ;;  %s4367_s4 = inlined_call_operand.hbm [shape: bf16[384,512], index: 4, kind: input, shape index: {}]   ;;  %s4368_s5 = inlined_call_operand.vmem [shape: f32[1,512], index: 5, kind: input, shape index: {}]   ;;  %s4369_s6 = inlined_call_operand.hbm [shape: bf16[512,128], index: 6, kind: input, shape index: {}]   ;;  %s4370_s7 = inlined_call_operand.vmem [shape: f32[1,128], index: 7, kind: input, shape index: {}]   ;;  %s4371_s8 = inlined_call_operand.hbm [shape: f32[16,128], index: 8, kind: output, shape index: {}]  }
   0x1   :  { %14 = vsyncpa [#allocation6], 0 }
   0x2   :  { %15 = vsyncpa [#allocation4], 0  ;;  %s3622_s27 = smov [#allocation2]   ;;  %s3550_s9 = scalar_lea.hbm %s4367_s4, 12288 }
   0x3   :  { %s29_s28 = sshll.u32 %s3622_s27, 4  ;;  %p3551_p0 = scmp.ne.s32.totalorder %s4367_s4, %s3550_s9  ;;  %s30_s28 = int_to_ptr.vmem [resolvable:$true] %s29_s28 }
   0x4   :  { %p3554_p1 = scmp.lt.u32.totalorder %s3550_s9, %s4367_s4 }
   0x6   :  { %p3556_p2 = pnand %p3554_p1, %p3551_p0 }
   0x8   :  { %3559 = shalt.err (!%p3556_p2)
}
   0x9   :  { %s3560_s14 = scalar_lea.vmem %s30_s28, 12288  ;;  %p3565_p4 = scmp.lt.s32.totalorder %s30_s28, %s30_s28 }
   0xa   :  { %p3561_p3 = scmp.ne.s32.totalorder %s30_s28, %s3560_s14  ;;  %p3566_p5 = scmp.lt.s32.totalorder %s3560_s14, %s3560_s14 }
   0xc   :  { %p3567_p6 = por %p3566_p5, %p3565_p4 }
   0xe   :  { %p3568_p7 = pnand %p3567_p6, %p3561_p3 }
  0x10   :  { %3571 = shalt.err (!%p3568_p7)
}
  0x11   :  { %s3623_s15 = smov 256   ;;  %s3624_s16 = smov 16  }
  0x12   :  { %35 = dma.hbm_to_vmem [thread:$0]  %s4367_s4, 12288, %s30_s28, [#allocation3], %s3623_s15, %s3623_s15, %s3624_s16  }
  0x13   :  { %s3625_s19 = smov [#allocation5]   ;;  %s3572_s23 = scalar_lea.hbm %s4369_s6, 4096 }
  0x14   :  { %s43_s20 = sshll.u32 %s3625_s19, 4  ;;  %p3573_p8 = scmp.ne.s32.totalorder %s4369_s6, %s3572_s23  ;;  %s44_s20 = int_to_ptr.vmem [resolvable:$true] %s43_s20 }
  0x15   :  { %p3576_p9 = scmp.lt.u32.totalorder %s3572_s23, %s4369_s6 }
  0x17   :  { %p3578_p10 = pnand %p3576_p9, %p3573_p8 }
  0x19   :  { %3581 = shalt.err (!%p3578_p10)
}
  0x1a   :  { %s3582_s29 = scalar_lea.vmem %s44_s20, 4096  ;;  %p3587_p12 = scmp.lt.s32.totalorder %s44_s20, %s44_s20 }
  0x1b   :  { %p3583_p11 = scmp.ne.s32.totalorder %s44_s20, %s3582_s29  ;;  %p3588_p13 = scmp.lt.s32.totalorder %s3582_s29, %s3582_s29 }
  0x1d   :  { %p3589_p0 = por %p3588_p13, %p3587_p12 }
  0x1f   :  { %p3590_p1 = pnand %p3589_p0, %p3583_p11 }
  0x21   :  { %3593 = shalt.err (!%p3590_p1)
}
  0x22   :  { %s3626_s4 = smov 64   ;;  %s3627_s28 = smov 4  }
  0x23   :  { %49 = dma.hbm_to_vmem [thread:$0]  %s4369_s6, 4096, %s44_s20, [#allocation6], %s3626_s4, %s3626_s4, %s3627_s28  }
  0x24   :  { %3616 = dma.done.wait [#allocation3], 12288  }
  0x25   :  { %3617 = vsyncadd [#allocation3], 4294955008 }
  0x26   :  { %3618 = dma.done.wait [#allocation6], 4096  }
  0x27   :  { %3619 = vsyncadd [#allocation6], 4294963200  ;;  %v3628_v0 = vmov 0   ;;  %v905_v1 = vld [vmem:[%s4364_s1] sm:$0xff]  ;;  %v906_v3 = vld [vmem:[%s4364_s1 + $0x8] sm:$0xff] }
  0x28   :  { %3317 = vset.pattern.permute.xlu1 %v3628_v0  ;;  %3316 = vset.pattern.permute.xlu0 %v3628_v0  ;;  %v61_v2 = vld [vmem:[%s4363_s0] sm:$0xff]  ;;  %v62_v4 = vld [vmem:[%s4363_s0 + $0x8] sm:$0xff]  ;;  %v3629_v39 = vmov 683565275   ;;  %v3630_v41 = vmov 2475754826  }
  0x29   :  { %422 = vmatprep.mubr.bf16.mxu0 %v3628_v0  ;;  %465 = vmatprep.mubr.bf16.mxu1 %v3628_v0  ;;  %v1722_v5 = vld [vmem:[%s4365_s2 + $0x8] sm:$0xff]  ;;  %v1721_v6 = vld [vmem:[%s4365_s2] sm:$0xff]  ;;  %v3631_v43 = vmov 2131351028   ;;  %v3632_v45 = vmov 2102212464  }
  0x2a   :  { %909 = vperm.xlu1 %3317, %v905_v1   ;;  %65 = vperm.xlu0 %3316, %v61_v2   ;;  %v3732_v7 = vld [vmem:[%s4366_s3] ss:$0 sm:$0xff]  ;;  %v3633_v47 = vmov 920167782   ;;  %v3634_v56 = vmov 1326507024  }
  0x2e   :  { %914 = vperm.xlu1 %3317, %v906_v3   ;;  %70 = vperm.xlu0 %3316, %v62_v4  }
  0x32   :  { %1730 = vperm.xlu1 %3317, %v1722_v5   ;;  %1725 = vperm.xlu0 %3316, %v1721_v6  }
  0xa9   :  { %v910_v8 = vpop.permute.xlu1 %909  ;;  %v66_v9 = vpop.permute.xlu0 %65 }
  0xaa   :  { %v3735_v10 = vmul.f32 %v3732_v7, %v910_v8  ;;  %v3738_v11 = vmul.f32 %v3732_v7, %v66_v9 }
  0xac   :  { %v919_v12 = vand.u32 2147483647, %v3735_v10  ;;  %v922_v13 = vand.u32 2139095040, %v3735_v10  ;;  %v81_v14 = vand.u32 2147483647, %v3738_v11  ;;  %v84_v15 = vand.u32 2139095040, %v3738_v11 }
  0xad   :  { %v915_v16 = vpop.permute.xlu1 %914 }
  0xae   :  { %v923_v17 = vshrl.u32 %v922_v13, 23  ;;  %v3745_v18 = vmul.f32 %v3732_v7, %v915_v16  ;;  %v926_v19 = vand.u32 8388607, %v919_v12  ;;  %v85_v20 = vshrl.u32 %v84_v15, 23 }
  0xaf   :  { %v88_v21 = vand.u32 8388607, %v81_v14 }
  0xb0   :  { %v3039_v22 = vadd.s32 4294967169, %v923_v17  ;;  %v2987_v23 = vadd.s32 4294967169, %v85_v20  ;;  %v1026_v24 = vand.u32 2139095040, %v3745_v18  ;;  %v927_v26 = vor.u32 8388608, %v926_v19 }
  0xb1   :  { %v89_v27 = vor.u32 8388608, %v88_v21 }
  0xb2   :  { %v929_v25 = vadd.s32 1, %v3039_v22  ;;  %v91_v28 = vadd.s32 1, %v2987_v23  ;;  %v1027_v29 = vshrl.u32 %v1026_v24, 23  ;;  %v3752_v35 = vshll.u32 %v927_v26, 8 }
  0xb3   :  { %v3754_v37 = vshll.u32 %v89_v27, 8 }
  0xb4   :  { %vm930_vm0 = vcmp.gt.s32.totalorder %v929_v25, 0  ;;  %vm92_vm1 = vcmp.gt.s32.totalorder %v91_v28, 0  ;;  %v3043_v31 = vadd.s32 4294967169, %v1027_v29 }
  0xb5   :  { %v931_v30 = vsel %vm930_vm0, %v929_v25, 0  ;;  %v93_v33 = vsel %vm92_vm1, %v91_v28, 0 }
  0xb6   :  { %v933_v32 = vand.u32 31, %v931_v30  ;;  %v932_v34 = vshrl.u32 %v931_v30, 5  ;;  %v95_v36 = vand.u32 31, %v93_v33  ;;  %v3761_v49 = vshrl.u32 %v93_v33, 5 }
  0xb7   :  { %v3763_v50 = vadd.s32 1, %v3043_v31 }
  0xb8   :  { %v934_v38 = vsub.s32 32, %v933_v32  ;;  %v936_v40 = vshll.u32 %v3629_v39, %v933_v32  ;;  %v939_v42 = vshll.u32 %v3630_v41, %v933_v32  ;;  %v942_v44 = vshll.u32 %v3631_v43, %v933_v32 }
  0xb9   :  { %v945_v46 = vshll.u32 %v3632_v45, %v933_v32  ;;  %v948_v48 = vshll.u32 %v3633_v47, %v933_v32  ;;  %vm951_vm2 = vcmp.lt.s32.totalorder %v932_v34, 1  ;;  %vm954_vm3 = vcmp.lt.s32.totalorder %v932_v34, 4 }
  0xba   :  { %v935_v51 = vshrl.u32 %v3629_v39, %v934_v38  ;;  %v937_v52 = vshrl.u32 %v3630_v41, %v934_v38  ;;  %v940_v53 = vshrl.u32 %v3631_v43, %v934_v38  ;;  %v943_v54 = vshrl.u32 %v3632_v45, %v934_v38 }
  0xbb   :  { %v946_v55 = vshrl.u32 %v3633_v47, %v934_v38  ;;  %v949_v57 = vshrl.u32 %v3634_v56, %v934_v38  ;;  %v96_v61 = vsub.s32 32, %v95_v36  ;;  %vm952_vm4 = vcmp.lt.s32.totalorder %v932_v34, 2 }
  0xbc   :  { %v938_v58 = vor.u32 %v937_v52, %v936_v40  ;;  %v941_v59 = vor.u32 %v940_v53, %v939_v42  ;;  %v944_v60 = vor.u32 %v943_v54, %v942_v44  ;;  %vm953_vm5 = vcmp.lt.s32.totalorder %v932_v34, 3 }
  0xbd   :  { %v947_v62 = vor.u32 %v946_v55, %v945_v46  ;;  %v950_v63 = vor.u32 %v949_v57, %v948_v48  ;;  %v98_v9 = vshll.u32 %v3629_v39, %v95_v36  ;;  %v99_v16 = vshrl.u32 %v3630_v41, %v96_v61 }
  0xbe   :  { %v955_v1 = vsel %vm951_vm2, %v935_v51, %v938_v58  ;;  %v956_v2 = vsel %vm954_vm3, %v944_v60, 2102212464  ;;  %v959_v3 = vsel %vm951_vm2, %v938_v58, %v941_v59  ;;  %v963_v4 = vsel %vm951_vm2, %v941_v59, %v944_v60 }
  0xbf   :  { %v957_v5 = vsel %vm953_vm5, %v941_v59, %v956_v2  ;;  %v960_v6 = vsel %vm954_vm3, %v947_v62, 920167782  ;;  %v964_v8 = vsel %vm954_vm3, %v950_v63, 1326507024  ;;  %v101_v17 = vshll.u32 %v3630_v41, %v95_v36 }
  0xc0   :  { %v961_v13 = vsel %vm953_vm5, %v944_v60, %v960_v6  ;;  %v965_v15 = vsel %vm953_vm5, %v947_v62, %v964_v8  ;;  %v958_v19 = vsel %vm952_vm4, %v955_v1, %v957_v5  ;;  %v102_v22 = vshrl.u32 %v3631_v43, %v96_v61 }
  0xc1   :  { %v962_v20 = vsel %vm952_vm4, %v959_v3, %v961_v13  ;;  %v966_v21 = vsel %vm952_vm4, %v963_v4, %v965_v15  ;;  %v100_v27 = vor.u32 %v99_v16, %v98_v9  ;;  %v104_v29 = vshll.u32 %v3631_v43, %v95_v36  ;;  %v71_v13 = vpop.permute.xlu0 %70 }
  0xc2   :  { %v3779_v23 = vmul.u32.u64.low %v3752_v35, %v966_v21  ;;  %v3780_v24 = vmul.u32.u64.high %v3752_v35, %v966_v21, %v3779_v23  ;;  %v3783_v25 = vmul.u32.u64.low %v3752_v35, %v962_v20  ;;  %v3784_v26 = vmul.u32.u64.high %v3752_v35, %v962_v20, %v3783_v25  ;;  %v3320_v21 = vld [vmem:[#allocation2 + $0xc] ss:$16 sps:$4 sm:$0xff]  }
  0xc3   :  { %v103_v28 = vor.u32 %v102_v22, %v101_v17  ;;  %v105_v30 = vshrl.u32 %v3632_v45, %v96_v61  ;;  %v97_v31 = vshrl.u32 %v3629_v39, %v96_v61  ;;  %v107_v32 = vshll.u32 %v3632_v45, %v95_v36  ;;  %433 = vmatprep.subr.bf16.mxu1 %v3320_v21 }
  0xc4   :  { %v108_v33 = vshrl.u32 %v3633_v47, %v96_v61  ;;  %v111_v34 = vshrl.u32 %v3634_v56, %v96_v61  ;;  %v974_v38 = vmul.u32 %v3752_v35, %v958_v19  ;;  %v110_v42 = vshll.u32 %v3633_v47, %v95_v36 }
  0xc5   :  { %v106_v40 = vor.u32 %v105_v30, %v104_v29  ;;  %vm113_vm6 = vcmp.lt.s32.totalorder %v3761_v49, 1  ;;  %vm976_vm7 = vc.u32 %v3780_v24, %v3783_v25  ;;  %v977_v44 = vadd.s32 1, %v3784_v26 }
  0xc6   :  { %v109_v46 = vor.u32 %v108_v33, %v107_v32  ;;  %vm114_vm8 = vcmp.lt.s32.totalorder %v3761_v49, 2  ;;  %v112_v48 = vor.u32 %v111_v34, %v110_v42  ;;  %vm115_vm9 = vcmp.lt.s32.totalorder %v3761_v49, 3  ;;  %v3324_v34 = vld [vmem:[#allocation2 + $0x24] ss:$16 sps:$4 sm:$0xff]  }
  0xc7   :  { %vm116_vm10 = vcmp.lt.s32.totalorder %v3761_v49, 4  ;;  %v121_v51 = vsel %vm113_vm6, %v100_v27, %v103_v28  ;;  %v978_v35 = vsel %vm976_vm7, %v977_v44, %v3784_v26  ;;  %v125_v53 = vsel %vm113_vm6, %v103_v28, %v106_v40  ;;  %v3326_v44 = vld [vmem:[#allocation2 + $0x2c] ss:$16 sps:$4 sm:$0xff]  }
  0xc8   :  { %v118_v52 = vsel %vm116_vm10, %v106_v40, 2102212464  ;;  %v122_v36 = vsel %vm116_vm10, %v109_v46, 920167782  ;;  %v979_v54 = vadd.s32 %v978_v35, %v974_v38  ;;  %v117_v55 = vsel %vm113_vm6, %v97_v31, %v100_v27  ;;  %v3322_v27 = vld [vmem:[#allocation2] ss:$16 sps:$4 sm:$0xff]  }
  0xc9   :  { %v123_v57 = vsel %vm115_vm9, %v106_v40, %v122_v36  ;;  %v126_v58 = vsel %vm116_vm10, %v112_v48, 1326507024  ;;  %v119_v59 = vsel %vm115_vm9, %v103_v28, %v118_v52  ;;  %vm1034_vm11 = vcmp.gt.s32.totalorder %v3763_v50, 0  ;;  %v3329_v36 = vld [vmem:[#allocation2 + $0x28] ss:$16 sps:$4 sm:$0xff]  }
  0xca   :  { %v124_v60 = vsel %vm114_vm8, %v121_v51, %v123_v57  ;;  %v127_v61 = vsel %vm115_vm9, %v109_v46, %v126_v58  ;;  %v980_v62 = vadd.s32 536870912, %v979_v54  ;;  %v1023_v5 = vand.u32 2147483647, %v3745_v18  ;;  %v3328_v46 = vld [vmem:[#allocation2 + $0x20] ss:$16 sps:$4 sm:$0xff]  }
  0xcb   :  { %v128_v63 = vsel %vm114_vm8, %v125_v53, %v127_v61  ;;  %v3809_v1 = vmul.u32.u64.low %v3754_v37, %v124_v60  ;;  %v3810_v2 = vmul.u32.u64.high %v3754_v37, %v124_v60, %v3809_v1  ;;  %v1035_v6 = vsel %vm1034_vm11, %v3763_v50, 0  ;;  %v3318_v50 = vld [vmem:[#allocation2 + $0x4] ss:$16 sps:$4 sm:$0xff]   ;;  %v3332_v60 = vld [vmem:[#allocation2 + $0x4c] ss:$16 sps:$4 sm:$0xff]  }
  0xcc   :  { %v3814_v3 = vmul.u32.u64.low %v3754_v37, %v128_v63  ;;  %v3815_v4 = vmul.u32.u64.high %v3754_v37, %v128_v63, %v3814_v3  ;;  %v120_v8 = vsel %vm114_vm8, %v117_v55, %v119_v59  ;;  %v1037_v9 = vand.u32 31, %v1035_v6  ;;  %390 = vmatprep.subr.bf16.mxu0 %v3318_v50  ;;  %v3330_v53 = vld [vmem:[#allocation2 + $0x44] ss:$16 sps:$4 sm:$0xff]  }
  0xcd   :  { %v3821_v15 = vshrl.u32 %v980_v62, 30  ;;  %v139_v16 = vadd.s32 1, %v3810_v2  ;;  %v136_v19 = vmul.u32 %v3754_v37, %v120_v8  ;;  %v3829_v20 = vand.u32 8388607, %v1023_v5  ;;  %v3323_v37 = vld [vmem:[#allocation2 + $0x8] ss:$16 sps:$4 sm:$0xff]   ;;  %391 = vmatpush1.bf16.msra.mxu0 %v3322_v27 }
  0xce   :  { %v1038_v17 = vsub.s32 32, %v1037_v9  ;;  %vm138_vm12 = vc.u32 %v3815_v4, %v3809_v1  ;;  %v1040_v22 = vshll.u32 %v3629_v39, %v1037_v9  ;;  %v1043_v23 = vshll.u32 %v3630_v41, %v1037_v9  ;;  %434 = vmatpush1.bf16.msra.mxu1 %v3323_v37  ;;  %392 = vmatprep.subr.bf16.mxu0 %v3324_v34  ;;  %v3335_v3 = vld [vmem:[#allocation2 + $0x48] ss:$16 sps:$4 sm:$0xff]  }
  0xcf   :  { %v140_v49 = vsel %vm138_vm12, %v139_v16, %v3810_v2  ;;  %v3835_v26 = vmul.f32 %v3732_v7, %v71_v13  ;;  %v982_v31 = vshll.u32 %v3821_v15, 30  ;;  %v3840_v32 = vshrl.u32 %v1035_v6, 5  ;;  %435 = vmatprep.subr.bf16.mxu1 %v3326_v44  ;;  %v3334_v2 = vld [vmem:[#allocation2 + $0x40] ss:$16 sps:$4 sm:$0xff]   ;;  %v3338_v13 = vld [vmem:[#allocation2 + $0x6c] ss:$16 sps:$4 sm:$0xff]  }
  0xd0   :  { %v141_v28 = vadd.s32 %v140_v49, %v136_v19  ;;  %v1041_v29 = vshrl.u32 %v3630_v41, %v1038_v17  ;;  %v1044_v30 = vshrl.u32 %v3631_v43, %v1038_v17  ;;  %v1046_v33 = vshll.u32 %v3631_v43, %v1037_v9 }
  0xd1   :  { %v1031_v40 = vor.u32 8388608, %v3829_v20  ;;  %v1047_v42 = vshrl.u32 %v3632_v45, %v1038_v17  ;;  %v1049_v51 = vshll.u32 %v3632_v45, %v1037_v9  ;;  %v1050_v35 = vshrl.u32 %v3633_v47, %v1038_v17  ;;  %393 = vmatpush1.bf16.msra.mxu0 %v3328_v46 }
  0xd2   :  { %v142_v38 = vadd.s32 536870912, %v141_v28  ;;  %v1042_v48 = vor.u32 %v1041_v29, %v1040_v22  ;;  %v188_v52 = vand.u32 2139095040, %v3835_v26  ;;  %v1045_v57 = vor.u32 %v1044_v30, %v1043_v23  ;;  %436 = vmatpush1.bf16.msra.mxu1 %v3329_v36  ;;  %394 = vmatprep.subr.bf16.mxu0 %v3330_v53  ;;  %v3340_v22 = vld [vmem:[#allocation2 + $0x60] ss:$16 sps:$4 sm:$0xff]   ;;  %v3341_v23 = vld [vmem:[#allocation2 + $0x68] ss:$16 sps:$4 sm:$0xff]  }
  0xd3   :  { %v1052_v58 = vshll.u32 %v3633_v47, %v1037_v9  ;;  %v1053_v59 = vshrl.u32 %v3634_v56, %v1038_v17  ;;  %v3852_v61 = vsub.s32 %v979_v54, %v982_v31  ;;  %v1048_v62 = vor.u32 %v1047_v42, %v1046_v33  ;;  %437 = vmatprep.subr.bf16.mxu1 %v3332_v60  ;;  %v3336_v9 = vld [vmem:[#allocation2 + $0x64] ss:$16 sps:$4 sm:$0xff]   ;;  %v3347_v31 = vld [vmem:[#allocation2 + $0x8c] ss:$16 sps:$4 sm:$0xff]  }
  0xd4   :  { %v3848_v55 = vshrl.u32 %v142_v38, 30  ;;  %v1051_v63 = vor.u32 %v1050_v35, %v1049_v51  ;;  %vm1055_vm13 = vcmp.lt.s32.totalorder %v3840_v32, 1  ;;  %v1039_v8 = vshrl.u32 %v3629_v39, %v1038_v17  ;;  %v3344_v30 = vld [vmem:[#allocation2 + $0x84] ss:$16 sps:$4 sm:$0xff]  }
  0xd5   :  { %vm1057_vm14 = vcmp.lt.s32.totalorder %v3840_v32, 3  ;;  %v1054_v54 = vor.u32 %v1053_v59, %v1052_v58  ;;  %vm1056_vm15 = vcmp.lt.s32.totalorder %v3840_v32, 2  ;;  %vm1058_vm0 = vcmp.lt.s32.totalorder %v3840_v32, 4  ;;  %395 = vmatpush1.bf16.msra.mxu0 %v3334_v2  ;;  %v1731_v2 = vpop.permute.xlu1 %1730 }
  0xd6   :  { %v144_v6 = vshll.u32 %v3848_v55, 30  ;;  %v189_v16 = vshrl.u32 %v188_v52, 23  ;;  %v1060_v20 = vsel %vm1058_vm0, %v1048_v62, 2102212464  ;;  %v1063_v17 = vsel %vm1055_vm13, %v1042_v48, %v1045_v57  ;;  %438 = vmatpush1.bf16.msra.mxu1 %v3335_v3  ;;  %396 = vmatprep.subr.bf16.mxu0 %v3336_v9 }
  0xd7   :  { %v1064_v50 = vsel %vm1058_vm0, %v1051_v63, 920167782  ;;  %v985_v21 = vsub.s32 0, %v3852_v61  ;;  %v1059_v37 = vsel %vm1055_vm13, %v1039_v8, %v1042_v48  ;;  %v1071_v29 = vshll.u32 %v1031_v40, 8  ;;  %439 = vmatprep.subr.bf16.mxu1 %v3338_v13 }
  0xd8   :  { %v3860_v19 = vsub.s32 %v141_v28, %v144_v6  ;;  %v1065_v49 = vsel %vm1057_vm14, %v1048_v62, %v1064_v50  ;;  %v1061_v28 = vsel %vm1057_vm14, %v1045_v57, %v1060_v20  ;;  %v1067_v38 = vsel %vm1055_vm13, %v1045_v57, %v1048_v62 }
  0xd9   :  { %v1066_v33 = vsel %vm1056_vm15, %v1063_v17, %v1065_v49  ;;  %v1068_v42 = vsel %vm1058_vm0, %v1054_v54, 1326507024  ;;  %v2991_v44 = vadd.s32 4294967169, %v189_v16  ;;  %v3040_v46 = vmin.u32 %v985_v21, %v3852_v61  ;;  %397 = vmatpush1.bf16.msra.mxu0 %v3340_v22 }
  0xda   :  { %v147_v27 = vsub.s32 0, %v3860_v19  ;;  %v1062_v40 = vsel %vm1056_vm15, %v1059_v37, %v1061_v28  ;;  %v1069_v48 = vsel %vm1057_vm14, %v1051_v63, %v1068_v42  ;;  %440 = vmatpush1.bf16.msra.mxu1 %v3341_v23  ;;  %811 = vmatprep.subr.bf16.mxu0 %v3344_v30  ;;  %v185_v3 = vand.u32 2147483647, %v3835_v26 }
  0xdb   :  { %v1070_v35 = vsel %vm1056_vm15, %v1067_v38, %v1069_v48  ;;  %v3890_v52 = vmul.u32.u64.low %v1071_v29, %v1066_v33  ;;  %v3891_v36 = vmul.u32.u64.high %v1071_v29, %v1066_v33, %v3890_v52  ;;  %854 = vmatprep.subr.bf16.mxu1 %v3347_v31  ;;  %v195_v59 = vadd.s32 1, %v2991_v44 }
  0xdc   :  { %v2988_v34 = vmin.u32 %v147_v27, %v3860_v19  ;;  %v3894_v53 = vmul.u32.u64.low %v1071_v29, %v1070_v35  ;;  %v3895_v57 = vmul.u32.u64.high %v1071_v29, %v1070_v35, %v3894_v53  ;;  %v987_v60 = vclz %v3040_v46 }
  0xdd   :  { %v1078_v62 = vmul.u32 %v1071_v29, %v1062_v40  ;;  %v1081_v63 = vadd.s32 1, %v3891_v36  ;;  %vm196_vm1 = vcmp.gt.s32.totalorder %v195_v59, 0  ;;  %v3903_v13 = vmul.f32 %v3732_v7, %v1731_v2 }
  0xde   :  { %v149_v51 = vclz %v2988_v34  ;;  %vm1080_vm3 = vc.u32 %v3895_v57, %v3890_v52  ;;  %v3041_v6 = vadd.s32 4294967294, %v987_v60  ;;  %v197_v9 = vsel %vm196_vm1, %v195_v59, 0 }
  0xdf   :  { %v1082_v32 = vsel %vm1080_vm3, %v1081_v63, %v3891_v36  ;;  %v199_v16 = vand.u32 31, %v197_v9  ;;  %v192_v17 = vand.u32 8388607, %v185_v3  ;;  %v1842_v22 = vand.u32 2139095040, %v3903_v13 }
  0xe0   :  { %v2989_v58 = vadd.s32 4294967294, %v149_v51  ;;  %v1083_v8 = vadd.s32 %v1082_v32, %v1078_v62  ;;  %vm3042_vm4 = vcmp.lt.s32.totalorder %v3041_v6, 0  ;;  %v137_v27 = vadd.s32 %v3809_v1, %v3815_v4 }
  0xe1   :  { %v200_v50 = vsub.s32 32, %v199_v16  ;;  %v3913_v28 = vsel %vm3042_vm4, 0, %v3041_v6  ;;  %v193_v29 = vor.u32 8388608, %v192_v17  ;;  %v1843_v42 = vshrl.u32 %v1842_v22, 23 }
  0xe2   :  { %vm2990_vm2 = vcmp.lt.s32.totalorder %v2989_v58, 0  ;;  %v1084_v20 = vadd.s32 536870912, %v1083_v8  ;;  %v198_v46 = vshrl.u32 %v197_v9, 5  ;;  %v202_v40 = vshll.u32 %v3629_v39, %v199_v16 }
  0xe3   :  { %v152_v54 = vsel %vm2990_vm2, 0, %v2989_v58  ;;  %v203_v30 = vshrl.u32 %v3630_v41, %v200_v50  ;;  %v206_v31 = vshrl.u32 %v3631_v43, %v200_v50  ;;  %v209_v38 = vshrl.u32 %v3632_v45, %v200_v50 }
  0xe4   :  { %v157_v21 = vsub.s32 4294967266, %v152_v54  ;;  %v3907_v49 = vshrl.u32 %v1084_v20, 30  ;;  %v153_v23 = vsub.s32 32, %v152_v54  ;;  %v205_v1 = vshll.u32 %v3630_v41, %v199_v16 }
  0xe5   :  { %v208_v48 = vshll.u32 %v3631_v43, %v199_v16  ;;  %v211_v51 = vshll.u32 %v3632_v45, %v199_v16  ;;  %v212_v35 = vshrl.u32 %v3633_v47, %v200_v50  ;;  %v204_v36 = vor.u32 %v203_v30, %v202_v40 }
  0xe6   :  { %v1086_v37 = vshll.u32 %v3907_v49, 30  ;;  %v158_v33 = vadd.s32 127, %v157_v21  ;;  %v155_v44 = vshrl.u32 %v137_v27, %v153_v23  ;;  %v207_v53 = vor.u32 %v206_v31, %v205_v1 }
  0xe7   :  { %v214_v58 = vshll.u32 %v3633_v47, %v199_v16  ;;  %v215_v59 = vshrl.u32 %v3634_v56, %v200_v50  ;;  %v167_v62 = vsub.s32 4, %v3848_v55  ;;  %v210_v63 = vor.u32 %v209_v38, %v208_v48 }
  0xe8   :  { %v3917_v34 = vsub.s32 %v1083_v8, %v1086_v37  ;;  %v159_v60 = vshll.u32 %v158_v33, 23  ;;  %v213_v2 = vor.u32 %v212_v35, %v211_v51  ;;  %v995_v32 = vsub.s32 4294967266, %v3913_v28 }
  0xe9   :  { %v154_v6 = vshll.u32 %v3860_v19, %v152_v54  ;;  %v216_v8 = vor.u32 %v215_v59, %v214_v58  ;;  %v233_v9 = vshll.u32 %v193_v29, 8  ;;  %vm83_vm5 = vcmp.lt.s32.totalorder %v3738_v11, 0  ;;  %v1726_v58 = vpop.permute.xlu0 %1725 }
  0xea   :  { %v1089_v4 = vsub.s32 0, %v3917_v34  ;;  %vm217_vm6 = vcmp.lt.s32.totalorder %v198_v46, 1  ;;  %vm220_vm7 = vcmp.lt.s32.totalorder %v198_v46, 4  ;;  %v3095_v16 = vadd.s32 4294967169, %v1843_v42 }
  0xeb   :  { %v156_v17 = vor.u32 %v155_v44, %v154_v6  ;;  %vm219_vm8 = vcmp.lt.s32.totalorder %v198_v46, 3  ;;  %v225_v21 = vsel %vm217_vm6, %v204_v36, %v207_v53  ;;  %v226_v22 = vsel %vm220_vm7, %v213_v2, 920167782 }
  0xec   :  { %v3044_v20 = vmin.u32 %v1089_v4, %v3917_v34  ;;  %v160_v23 = vor.u32 4788187, %v159_v60  ;;  %vm218_vm9 = vcmp.lt.s32.totalorder %v198_v46, 2  ;;  %v222_v27 = vsel %vm220_vm7, %v210_v63, 2102212464 }
  0xed   :  { %v227_v37 = vsel %vm219_vm8, %v210_v63, %v226_v22  ;;  %v201_v19 = vshrl.u32 %v3629_v39, %v200_v50  ;;  %v229_v29 = vsel %vm217_vm6, %v207_v53, %v210_v63  ;;  %v230_v30 = vsel %vm220_vm7, %v216_v8, 1326507024 }
  0xee   :  { %v228_v54 = vsel %vm218_vm9, %v225_v21, %v227_v37  ;;  %v1091_v31 = vclz %v3044_v20  ;;  %v231_v33 = vsel %vm219_vm8, %v213_v2, %v230_v30  ;;  %v223_v40 = vsel %vm219_vm8, %v207_v53, %v222_v27 }
  0xef   :  { %v3937_v38 = vmul.u32.u64.low %v233_v9, %v228_v54  ;;  %v3938_v42 = vmul.u32.u64.high %v233_v9, %v228_v54, %v3937_v38  ;;  %v221_v44 = vsel %vm217_vm6, %v201_v19, %v204_v36  ;;  %v232_v1 = vsel %vm218_vm9, %v229_v29, %v231_v33 }
  0xf0   :  { %v1849_v4 = vadd.s32 1, %v3095_v16  ;;  %v975_v50 = vadd.s32 %v3783_v25, %v3780_v24  ;;  %v991_v48 = vsub.s32 32, %v3913_v28  ;;  %v3946_v51 = vadd.s32 127, %v995_v32 }
  0xf1   :  { %v1839_v35 = vand.u32 2147483647, %v3903_v13  ;;  %v161_v59 = vand.u32 2147483647, %v160_v23  ;;  %v3949_v60 = vmul.u32.u64.low %v233_v9, %v232_v1  ;;  %v3950_v63 = vmul.u32.u64.high %v233_v9, %v232_v1, %v3949_v60 }
  0xf2   :  { %vm1850_vm10 = vcmp.gt.s32.totalorder %v1849_v4, 0  ;;  %v3045_v36 = vadd.s32 4294967294, %v1091_v31  ;;  %v224_v53 = vsel %vm218_vm9, %v221_v44, %v223_v40  ;;  %v243_v2 = vadd.s32 1, %v3938_v42 }
  0xf3   :  { %v1851_v6 = vsel %vm1850_vm10, %v1849_v4, 0  ;;  %v163_v8 = vcvt.s32.f32 %v156_v17  ;;  %v168_v24 = vsel %vm83_vm5, %v167_v62, %v3848_v55  ;;  %v3958_v32 = vmul.f32 %v3732_v7, %v1726_v58 }
  0xf4   :  { %v1853_v25 = vand.u32 31, %v1851_v6  ;;  %v992_v20 = vshll.u32 %v3852_v61, %v3913_v28  ;;  %v993_v16 = vshrl.u32 %v975_v50, %v991_v48  ;;  %v997_v21 = vshll.u32 %v3946_v51, 23 }
  0xf5   :  { %v1846_v46 = vand.u32 8388607, %v1839_v35  ;;  %v164_v22 = vmul.f32 %v163_v8, %v161_v59  ;;  %v240_v23 = vmul.u32 %v233_v9, %v224_v53  ;;  %vm242_vm11 = vc.u32 %v3950_v63, %v3937_v38 }
  0xf6   :  { %v1854_v17 = vsub.s32 32, %v1853_v25  ;;  %vm3046_vm12 = vcmp.lt.s32.totalorder %v3045_v36, 0  ;;  %v244_v55 = vsel %vm242_vm11, %v243_v2, %v3938_v42  ;;  %v1856_v7 = vshll.u32 %v3629_v39, %v1853_v25 }
  0xf7   :  { %v1859_v62 = vshll.u32 %v3630_v41, %v1853_v25  ;;  %v245_v61 = vadd.s32 %v244_v55, %v240_v23  ;;  %v1852_v28 = vshrl.u32 %v1851_v6, 5  ;;  %v1847_v19 = vor.u32 8388608, %v1846_v46 }
  0xf8   :  { %v1857_v27 = vshrl.u32 %v3630_v41, %v1854_v17  ;;  %v1860_v37 = vshrl.u32 %v3631_v43, %v1854_v17  ;;  %v1862_v9 = vshll.u32 %v3631_v43, %v1853_v25  ;;  %v1863_v54 = vshrl.u32 %v3632_v45, %v1854_v17 }
  0xf9   :  { %v1865_v29 = vshll.u32 %v3632_v45, %v1853_v25  ;;  %v246_v30 = vadd.s32 536870912, %v245_v61  ;;  %v1855_v31 = vshrl.u32 %v3629_v39, %v1854_v17  ;;  %v1866_v42 = vshrl.u32 %v3633_v47, %v1854_v17 }
  0xfa   :  { %v1861_v33 = vor.u32 %v1860_v37, %v1859_v62  ;;  %v165_v44 = vxor.u32 2147483648, %v164_v22  ;;  %v1858_v40 = vor.u32 %v1857_v27, %v1856_v7  ;;  %v1868_v1 = vshll.u32 %v3633_v47, %v1853_v25 }
  0xfb   :  { %v1869_v4 = vshrl.u32 %v3634_v56, %v1854_v17  ;;  %v3979_v50 = vshrl.u32 %v246_v30, 30  ;;  %v1864_v48 = vor.u32 %v1863_v54, %v1862_v9  ;;  %v1867_v51 = vor.u32 %v1866_v42, %v1865_v29 }
  0xfc   :  { %vm1871_vm13 = vcmp.lt.s32.totalorder %v1852_v28, 1  ;;  %v3982_v58 = vsel %vm3046_vm12, 0, %v3045_v36  ;;  %vm1872_vm14 = vcmp.lt.s32.totalorder %v1852_v28, 2  ;;  %vm1874_vm15 = vcmp.lt.s32.totalorder %v1852_v28, 4 }
  0xfd   :  { %v1887_v59 = vshll.u32 %v1847_v19, 8  ;;  %v248_v60 = vshll.u32 %v3979_v50, 30  ;;  %vm1873_vm0 = vcmp.lt.s32.totalorder %v1852_v28, 3  ;;  %v1875_v53 = vsel %vm1871_vm13, %v1855_v31, %v1858_v40 }
  0xfe   :  { %v1876_v2 = vsel %vm1874_vm15, %v1864_v48, 2102212464  ;;  %v1870_v6 = vor.u32 %v1869_v4, %v1868_v1  ;;  %v1879_v25 = vsel %vm1871_vm13, %v1858_v40, %v1861_v33  ;;  %v1880_v46 = vsel %vm1874_vm15, %v1867_v51, 920167782 }
  0xff   :  { %v1877_v8 = vsel %vm1873_vm0, %v1861_v33, %v1876_v2  ;;  %v994_v23 = vor.u32 %v993_v16, %v992_v20  ;;  %v3990_v36 = vsub.s32 %v245_v61, %v248_v60  ;;  %v1738_v55 = vand.u32 2139095040, %v3958_v32 }
 0x100   :  { %v1878_v17 = vsel %vm1872_vm14, %v1875_v53, %v1877_v8  ;;  %vm3996_vm1 = vcmp.le.f32.partialorder %v81_v14, 0.7853982  ;;  %v1099_v62 = vsub.s32 4294967266, %v3982_v58  ;;  %v1881_v27 = vsel %vm1873_vm0, %v1864_v48, %v1880_v46 }
 0x101   :  { %v1883_v37 = vsel %vm1871_vm13, %v1861_v33, %v1864_v48  ;;  %v166_v20 = vsel %vm83_vm5, %v165_v44, %v164_v22  ;;  %v4007_v16 = vsel %vm3996_vm1, 0, %v168_v24  ;;  %vm187_vm2 = vcmp.lt.s32.totalorder %v3835_v26, 0 }
 0x102   :  { %v251_v14 = vsub.s32 0, %v3990_v36  ;;  %v1882_v61 = vsel %vm1872_vm14, %v1879_v25, %v1881_v27  ;;  %v998_v19 = vor.u32 4788187, %v997_v21  ;;  %v1884_v9 = vsel %vm1874_vm15, %v1870_v6, 1326507024 }
 0x103   :  { %v4013_v54 = vmul.u32.u64.low %v1887_v59, %v1882_v61  ;;  %v4014_v29 = vmul.u32.u64.high %v1887_v59, %v1882_v61, %v4013_v54  ;;  %v1001_v30 = vcvt.s32.f32 %v994_v23  ;;  %v1885_v22 = vsel %vm1873_vm0, %v1867_v51, %v1884_v9 }
 0x104   :  { %v2992_v31 = vmin.u32 %v251_v14, %v3990_v36  ;;  %v1739_v33 = vshrl.u32 %v1738_v55, 23  ;;  %v169_v24 = vsel %vm3996_vm1, %v3738_v11, %v166_v20  ;;  %v1095_v42 = vsub.s32 32, %v3982_v58 }
 0x105   :  { %v1100_v44 = vadd.s32 127, %v1099_v62  ;;  %v1886_v21 = vsel %vm1872_vm14, %v1883_v37, %v1885_v22  ;;  %vm4025_vm3 = vcmp.le.f32.partialorder %v185_v3, 0.7853982  ;;  %v999_v60 = vand.u32 2147483647, %v998_v19 }
 0x106   :  { %v253_v1 = vclz %v2992_v31  ;;  %v4029_v4 = vmul.u32.u64.low %v1887_v59, %v1886_v21  ;;  %v4030_v48 = vmul.u32.u64.high %v1887_v59, %v1886_v21, %v4029_v4  ;;  %v3091_v51 = vadd.s32 4294967169, %v1739_v33 }
 0x107   :  { %v1079_v53 = vadd.s32 %v3890_v52, %v3895_v57  ;;  %v271_v2 = vsub.s32 4, %v3979_v50  ;;  %v1897_v28 = vadd.s32 1, %v4014_v29  ;;  %v1894_v8 = vmul.u32 %v1887_v59, %v1878_v17 }
 0x108   :  { %v2993_v6 = vadd.s32 4294967294, %v253_v1  ;;  %v1735_v3 = vand.u32 2147483647, %v3958_v32  ;;  %v1745_v25 = vadd.s32 1, %v3091_v51  ;;  %3494 = vcosq.f32 %v169_v24 }
 0x109   :  { %v1097_v46 = vshrl.u32 %v1079_v53, %v1095_v42  ;;  %v1101_v23 = vshll.u32 %v1100_v44, 23  ;;  %v241_v55 = vadd.s32 %v3937_v38, %v3950_v63  ;;  %v4040_v7 = vadd.s32 %v4013_v54, %v4030_v48 }
 0x10a   :  { %vm2994_vm4 = vcmp.lt.s32.totalorder %v2993_v6, 0  ;;  %vm1896_vm5 = vc.u32 %v4030_v48, %v4013_v54  ;;  %vm1746_vm6 = vcmp.gt.s32.totalorder %v1745_v25, 0  ;;  %v272_v57 = vsel %vm187_vm2, %v271_v2, %v3979_v50 }
 0x10b   :  { %v256_v52 = vsel %vm2994_vm4, 0, %v2993_v6  ;;  %v1898_v59 = vsel %vm1896_vm5, %v1897_v28, %v4014_v29  ;;  %v1747_v17 = vsel %vm1746_vm6, %v1745_v25, 0  ;;  %v1742_v38 = vand.u32 8388607, %v1735_v3 }
 0x10c   :  { %v257_v62 = vsub.s32 32, %v256_v52  ;;  %v261_v27 = vsub.s32 4294967266, %v256_v52  ;;  %v1899_v37 = vadd.s32 %v1898_v59, %v1894_v8  ;;  %v4049_v63 = vmul.f32 %v1001_v30, %v999_v60 }
 0x10d   :  { %3496 = vsinq.f32 %v169_v24  ;;  %v1096_v20 = vshll.u32 %v3917_v34, %v3982_v58  ;;  %v1749_v14 = vand.u32 31, %v1747_v17  ;;  %v258_v61 = vshll.u32 %v3990_v36, %v256_v52 }
 0x10e   :  { %v259_v19 = vshrl.u32 %v241_v55, %v257_v62  ;;  %v262_v50 = vadd.s32 127, %v261_v27  ;;  %v1900_v9 = vadd.s32 536870912, %v1899_v37  ;;  %v4056_v29 = vor.u32 4788187, %v1101_v23 }
 0x10f   :  { %v4054_v54 = vor.u32 %v1097_v46, %v1096_v20  ;;  %v4060_v31 = vsel %vm4025_vm3, 0, %v272_v57  ;;  %v1750_v30 = vsub.s32 32, %v1749_v14  ;;  %v1743_v34 = vor.u32 8388608, %v1742_v38 }
 0x110   :  { %v260_v22 = vor.u32 %v259_v19, %v258_v61  ;;  %v263_v33 = vshll.u32 %v262_v50, 23  ;;  %v4062_v24 = vshrl.u32 %v1900_v9, 30  ;;  %v1755_v36 = vshll.u32 %v3630_v41, %v1749_v14 }
 0x111   :  { %v1753_v58 = vshrl.u32 %v3630_v41, %v1750_v30  ;;  %v1756_v42 = vshrl.u32 %v3631_v43, %v1750_v30  ;;  %v1759_v44 = vshrl.u32 %v3632_v45, %v1750_v30  ;;  %v1748_v4 = vshrl.u32 %v1747_v17, 5 }
 0x112   :  { %v264_v21 = vor.u32 4788187, %v263_v33  ;;  %v1902_v1 = vshll.u32 %v4062_v24, 30  ;;  %v1752_v48 = vshll.u32 %v3629_v39, %v1749_v14  ;;  %v4070_v51 = vpop.eup %3494  ;;  %v1758_v53 = vshll.u32 %v3631_v43, %v1749_v14 }
 0x113   :  { %v1757_v60 = vor.u32 %v1756_v42, %v1755_v36  ;;  %v1761_v2 = vshll.u32 %v3632_v45, %v1749_v14  ;;  %v1762_v28 = vshrl.u32 %v3633_v47, %v1750_v30  ;;  %v267_v6 = vcvt.s32.f32 %v260_v22 }
 0x114   :  { %v265_v41 = vand.u32 2147483647, %v264_v21  ;;  %v4075_v8 = vsub.s32 %v1899_v37, %v1902_v1  ;;  %v1754_v25 = vor.u32 %v1753_v58, %v1752_v48  ;;  %v1760_v46 = vor.u32 %v1759_v44, %v1758_v53 }
 0x115   :  { %v1763_v23 = vor.u32 %v1762_v28, %v1761_v2  ;;  %v1764_v55 = vshll.u32 %v3633_v47, %v1749_v14  ;;  %v1765_v52 = vshrl.u32 %v3634_v56, %v1750_v30  ;;  %v1751_v43 = vshrl.u32 %v3629_v39, %v1750_v30 }
 0x116   :  { %v268_v57 = vmul.f32 %v267_v6, %v265_v41  ;;  %v1905_v59 = vsub.s32 0, %v4075_v8  ;;  %v1783_v17 = vshll.u32 %v1743_v34, 8  ;;  %vm1767_vm7 = vcmp.lt.s32.totalorder %v1748_v4, 1 }
 0x117   :  { %v4081_v45 = vpop.eup %3496  ;;  %v1766_v62 = vor.u32 %v1765_v52, %v1764_v55  ;;  %vm1768_vm8 = vcmp.lt.s32.totalorder %v1748_v4, 2  ;;  %vm1769_vm9 = vcmp.lt.s32.totalorder %v1748_v4, 3  ;;  %vm1770_vm10 = vcmp.lt.s32.totalorder %v1748_v4, 4 }
 0x118   :  { %v269_v27 = vxor.u32 2147483648, %v268_v57  ;;  %v3096_v37 = vmin.u32 %v1905_v59, %v4075_v8  ;;  %v1771_v38 = vsel %vm1767_vm7, %v1751_v43, %v1754_v25  ;;  %v1772_v47 = vsel %vm1770_vm10, %v1760_v46, 2102212464 }
 0x119   :  { %v1775_v20 = vsel %vm1767_vm7, %v1754_v25, %v1757_v60  ;;  %v1776_v56 = vsel %vm1770_vm10, %v1763_v23, 920167782  ;;  %v1779_v14 = vsel %vm1767_vm7, %v1757_v60, %v1760_v46  ;;  %v1773_v19 = vsel %vm1769_vm9, %v1757_v60, %v1772_v47 }
 0x11a   :  { %v270_v61 = vsel %vm187_vm2, %v269_v27, %v268_v57  ;;  %v1907_v39 = vclz %v3096_v37  ;;  %v1777_v50 = vsel %vm1769_vm9, %v1760_v46, %v1776_v56  ;;  %v1774_v30 = vsel %vm1768_vm8, %v1771_v38, %v1773_v19 }
 0x11b   :  { %v273_v9 = vsel %vm4025_vm3, %v3835_v26, %v270_v61  ;;  %v1778_v22 = vsel %vm1768_vm8, %v1775_v20, %v1777_v50  ;;  %v1780_v33 = vsel %vm1770_vm10, %v1766_v62, 1326507024  ;;  %vm921_vm11 = vcmp.lt.s32.totalorder %v3735_v10, 0 }
 0x11c   :  { %3498 = vcosq.f32 %v273_v9  ;;  %v3097_v34 = vadd.s32 4294967294, %v1907_v39  ;;  %v1781_v58 = vsel %vm1769_vm9, %v1763_v23, %v1780_v33  ;;  %v174_v36 = vadd.s32 3, %v4007_v16 }
 0x11d   :  { %3500 = vsinq.f32 %v273_v9  ;;  %v1782_v42 = vsel %vm1768_vm8, %v1779_v14, %v1781_v58  ;;  %v4097_v44 = vmul.u32.u64.low %v1783_v17, %v1778_v22  ;;  %v4098_v21 = vmul.u32.u64.high %v1783_v17, %v1778_v22, %v4097_v44 }
 0x11e   :  { %v1003_v40 = vxor.u32 2147483648, %v4049_v63  ;;  %vm3098_vm12 = vcmp.lt.s32.totalorder %v3097_v34, 0  ;;  %v4101_v1 = vmul.u32.u64.low %v1783_v17, %v1782_v42  ;;  %v4102_v48 = vmul.u32.u64.high %v1783_v17, %v1782_v42, %v4101_v1 }
 0x11f   :  { %v1103_v60 = vand.u32 2147483647, %v4056_v29  ;;  %v1105_v53 = vcvt.s32.f32 %v4054_v54  ;;  %v1910_v2 = vsel %vm3098_vm12, 0, %v3097_v34  ;;  %v278_v28 = vadd.s32 3, %v4060_v31  ;;  %v3363_v29 = vld [vmem:[#allocation2 + $0xe8] ss:$16 sps:$4 sm:$0xff]  }
 0x120   :  { %v1911_v41 = vsub.s32 32, %v1910_v2  ;;  %v1915_v6 = vsub.s32 4294967266, %v1910_v2  ;;  %v175_v4 = vand.u32 3, %v174_v36  ;;  %v178_v25 = vxor.u32 2147483648, %v4081_v45 }
 0x121   :  { %v1912_v46 = vshll.u32 %v4075_v8, %v1910_v2  ;;  %v1790_v23 = vmul.u32 %v1783_v17, %v1774_v30  ;;  %v1793_v55 = vadd.s32 1, %v4098_v21  ;;  %v181_v52 = vxor.u32 2147483648, %v4070_v51 }
 0x122   :  { %vm4113_vm13 = vcmp.le.f32.partialorder %v919_v12, 0.7853982  ;;  %vm1025_vm14 = vcmp.lt.s32.totalorder %v3745_v18, 0  ;;  %v1913_v54 = vshrl.u32 %v4040_v7, %v1911_v41  ;;  %v1916_v57 = vadd.s32 127, %v1915_v6 }
 0x123   :  { %v4120_v59 = vadd.s32 %v4097_v44, %v4102_v48  ;;  %vm1792_vm15 = vc.u32 %v4102_v48, %v4097_v44  ;;  %v1106_v8 = vmul.f32 %v1105_v53, %v1103_v60  ;;  %vm173_vm0 = vweird.f32 %v3738_v11  ;;  %v3345_v53 = vld [vmem:[#allocation2 + $0x88] ss:$16 sps:$4 sm:$0xff]   ;;  %v3374_v11 = vld [vmem:[#allocation2 + $0x124] ss:$16 sps:$4 sm:$0xff]  }
 0x124   :  { %v1794_v43 = vsel %vm1792_vm15, %v1793_v55, %v4098_v21  ;;  %vm277_vm1 = vweird.f32 %v3835_v26  ;;  %v279_v12 = vand.u32 3, %v278_v28  ;;  %v1005_v17 = vsub.s32 4, %v3821_v15  ;;  %v3353_v55 = vld [vmem:[#allocation2 + $0xac] ss:$16 sps:$4 sm:$0xff]  }
 0x125   :  { %v1914_v62 = vor.u32 %v1913_v54, %v1912_v46  ;;  %v1917_v27 = vshll.u32 %v1916_v57, 23  ;;  %v1795_v37 = vadd.s32 %v1794_v43, %v1790_v23  ;;  %v1004_v7 = vsel %vm921_vm11, %v1003_v40, %v4049_v63  ;;  %v3342_v40 = vld [vmem:[#allocation2 + $0x80] ss:$16 sps:$4 sm:$0xff]   ;;  %v3350_v23 = vld [vmem:[#allocation2 + $0xa4] ss:$16 sps:$4 sm:$0xff]  }
 0x126   :  { %vm1841_vm2 = vcmp.lt.s32.totalorder %v3903_v13, 0  ;;  %vm177_vm3 = vcmp.eq.s32.totalorder %v175_v4, 0  ;;  %vm180_vm4 = vcmp.eq.s32.totalorder %v175_v4, 2  ;;  %v4131_v38 = vpop.eup %3498  ;;  %v1107_v39 = vxor.u32 2147483648, %v1106_v8  ;;  %v3369_v54 = vld [vmem:[#allocation2 + $0x108] ss:$16 sps:$4 sm:$0xff]  }
 0x127   :  { %v1918_v47 = vor.u32 4788187, %v1917_v27  ;;  %v1796_v20 = vadd.s32 536870912, %v1795_v37  ;;  %v179_v56 = vsel %vm177_vm3, %v4070_v51, %v178_v25  ;;  %v182_v14 = vsel %vm180_vm4, %v181_v52, %v4081_v45  ;;  %v4139_v61 = vpop.eup %3500 }
 0x128   :  { %vm176_vm5 = vcmp.lt.s32.totalorder %v175_v4, 2  ;;  %vm284_vm6 = vcmp.eq.s32.totalorder %v279_v12, 2  ;;  %v285_v63 = vxor.u32 2147483648, %v4131_v38  ;;  %v1921_v50 = vcvt.s32.f32 %v1914_v62  ;;  %v3351_v62 = vld [vmem:[#allocation2 + $0xa8] ss:$16 sps:$4 sm:$0xff]  }
 0x129   :  { %v1919_v19 = vand.u32 2147483647, %v1918_v47  ;;  %v4142_v9 = vshrl.u32 %v1796_v20, 30  ;;  %v282_v30 = vxor.u32 2147483648, %v4139_v61  ;;  %v1925_v22 = vsub.s32 4, %v4062_v24 }
 0x12a   :  { %v183_v33 = vsel %vm176_vm5, %v179_v56, %v182_v14  ;;  %vm281_vm7 = vcmp.eq.s32.totalorder %v279_v12, 0  ;;  %v286_v34 = vsel %vm284_vm6, %v285_v63, %v4139_v61  ;;  %vm280_vm8 = vcmp.lt.s32.totalorder %v279_v12, 2 }
 0x12b   :  { %v1922_v58 = vmul.f32 %v1921_v50, %v1919_v19  ;;  %v1798_v36 = vshll.u32 %v4142_v9, 30  ;;  %v283_v42 = vsel %vm281_vm7, %v4131_v38, %v282_v30  ;;  %v1007_v44 = vsel %vm4113_vm13, %v3735_v10, %v1004_v7  ;;  %v3359_v7 = vld [vmem:[#allocation2 + $0xcc] ss:$16 sps:$4 sm:$0xff]  }
 0x12c   :  { %v1108_v21 = vsel %vm1025_vm14, %v1107_v39, %v1106_v8  ;;  %v287_v1 = vsel %vm280_vm8, %v283_v42, %v286_v34  ;;  %vm386_vm9 = vcmask 523264   ;;  %v184_v2 = vsel %vm173_vm0, nan, %v183_v33  ;;  %v3365_v19 = vld [vmem:[#allocation2 + $0xec] ss:$16 sps:$4 sm:$0xff]  }
 0x12d   :  { %v1923_v48 = vxor.u32 2147483648, %v1922_v58  ;;  %v4154_v60 = vsub.s32 %v1795_v37, %v1798_v36  ;;  %v288_v28 = vsel %vm277_vm1, nan, %v287_v1  ;;  %v1109_v41 = vsub.s32 4, %v3907_v49  ;;  %v3356_v37 = vld [vmem:[#allocation2 + $0xc4] ss:$16 sps:$4 sm:$0xff]  }
 0x12e   :  { %v701_v6 = vand.u32 3, %v4060_v31  ;;  %v1926_v4 = vsel %vm1841_vm2, %v1925_v22, %v4062_v24  ;;  %v305_v46 = vpack.c.bf16 %v288_v28, %v184_v2  ;;  %vm4167_vm10 = vcmp.le.f32.partialorder %v1023_v5, 0.7853982 }
 0x12f   :  { %vm1840_vm12 = vcmp.le.f32.partialorder %v1839_v35, 0.7853982  ;;  %v1924_v57 = vsel %vm1841_vm2, %v1923_v48, %v1922_v58  ;;  %v1801_v31 = vsub.s32 0, %v4154_v60  ;;  %3502 = vcosq.f32 %v1007_v44 }
 0x130   :  { %v598_v24 = vand.u32 3, %v4007_v16  ;;  %v1111_v8 = vsel %vm4167_vm10, %v3745_v18, %v1108_v21  ;;  %v1927_v5 = vsel %vm1840_vm12, %v3903_v13, %v1924_v57  ;;  %3011 = vmatmul.mubr.msk.bf16.vlgmr.msra.gmra.mrb[0].mxu0 %vm386_vm9, %v305_v46  ;;  %3012 = vmatmul.mubr.msk.bf16.vlgmr.msra.gmra.mrb[0].mxu1 %vm386_vm9, %v305_v46  ;;  %v1006_v35 = vsel %vm921_vm11, %v1005_v17, %v3821_v15  ;;  %v3348_v16 = vld [vmem:[#allocation2 + $0xa0] ss:$16 sps:$4 sm:$0xff]   ;;  %v3368_v21 = vld [vmem:[#allocation2 + $0x104] ss:$16 sps:$4 sm:$0xff]  }
 0x131   :  { %v1928_v43 = vsel %vm1840_vm12, 0, %v1926_v4  ;;  %3504 = vcosq.f32 %v1927_v5  ;;  %v3092_v12 = vmin.u32 %v1801_v31, %v4154_v60  ;;  %812 = vmatpush1.bf16.msra.mxu0 %v3342_v40  ;;  %855 = vmatpush1.bf16.msra.mxu1 %v3345_v53  ;;  %v1110_v27 = vsel %vm1025_vm14, %v1109_v41, %v3907_v49  ;;  %v3371_v40 = vld [vmem:[#allocation2 + $0x10c] ss:$16 sps:$4 sm:$0xff]  }
 0x132   :  { %3506 = vsinq.f32 %v1927_v5  ;;  %vm703_vm15 = vcmp.eq.s32.totalorder %v701_v6, 0  ;;  %vm706_vm2 = vcmp.eq.s32.totalorder %v701_v6, 2  ;;  %813 = vmatprep.subr.bf16.mxu0 %v3350_v23  ;;  %856 = vmatprep.subr.bf16.mxu1 %v3353_v55  ;;  %v1932_v20 = vadd.s32 3, %v1928_v43  ;;  %v3377_v57 = vld [vmem:[#allocation2 + $0x12c] ss:$16 sps:$4 sm:$0xff]  }
 0x133   :  { %3508 = vcosq.f32 %v1111_v8  ;;  %v1803_v15 = vclz %v3092_v12  ;;  %v705_v17 = vsel %vm703_vm15, %v4131_v38, %v282_v30  ;;  %v708_v47 = vsel %vm706_vm2, %v285_v63, %v4139_v61  ;;  %843 = vmatprep.mubr.bf16.mxu0 %v3628_v0  ;;  %886 = vmatprep.mubr.bf16.mxu1 %v3628_v0  ;;  %v3354_v38 = vld [vmem:[#allocation2 + $0xc0] ss:$16 sps:$4 sm:$0xff]   ;;  %v3357_v61 = vld [vmem:[#allocation2 + $0xc8] ss:$16 sps:$4 sm:$0xff]   ;;  %v3362_v63 = vld [vmem:[#allocation2 + $0xe4] ss:$16 sps:$4 sm:$0xff]  }
 0x134   :  { %3510 = vsinq.f32 %v1111_v8  ;;  %vm600_vm11 = vcmp.eq.s32.totalorder %v598_v24, 0  ;;  %vm603_vm14 = vcmp.eq.s32.totalorder %v598_v24, 2  ;;  %vm702_vm3 = vcmp.lt.s32.totalorder %v701_v6, 2  ;;  %v3360_v30 = vld [vmem:[#allocation2 + $0xe0] ss:$16 sps:$4 sm:$0xff]  }
 0x135   :  { %v3093_v49 = vadd.s32 4294967294, %v1803_v15  ;;  %v602_v56 = vsel %vm600_vm11, %v4070_v51, %v178_v25  ;;  %v605_v14 = vsel %vm603_vm14, %v181_v52, %v4081_v45  ;;  %814 = vmatpush1.bf16.msra.mxu0 %v3348_v16  ;;  %857 = vmatpush1.bf16.msra.mxu1 %v3351_v62  ;;  %3512 = vsinq.f32 %v1007_v44  ;;  %v3366_v6 = vld [vmem:[#allocation2 + $0x100] ss:$16 sps:$4 sm:$0xff]   ;;  %v3375_v15 = vld [vmem:[#allocation2 + $0x128] ss:$16 sps:$4 sm:$0xff]  }
 0x136   :  { %v709_v39 = vsel %vm702_vm3, %v705_v17, %v708_v47  ;;  %815 = vmatprep.subr.bf16.mxu0 %v3356_v37  ;;  %858 = vmatprep.subr.bf16.mxu1 %v3359_v7  ;;  %v4202_v50 = vsel %vm4113_vm13, 0, %v1006_v35  ;;  %v4206_v25 = vsel %vm4167_vm10, 0, %v1110_v27  ;;  %vm599_vm5 = vcmp.lt.s32.totalorder %v598_v24, 2  ;;  %v3372_v16 = vld [vmem:[#allocation2 + $0x120] ss:$16 sps:$4 sm:$0xff]  }
 0x137   :  { %vm3094_vm4 = vcmp.lt.s32.totalorder %v3093_v49, 0  ;;  %v1933_v51 = vand.u32 3, %v1932_v20  ;;  %v606_v52 = vsel %vm599_vm5, %v602_v56, %v605_v14  ;;  %v2333_v22 = vand.u32 3, %v1928_v43  ;;  %v3380_v56 = vld [vmem:[#allocation2 + $0x144] ss:$16 sps:$4 sm:$0xff]  }
 0x138   :  { %v1806_v45 = vsel %vm3094_vm4, 0, %v3093_v49  ;;  %v710_v58 = vsel %vm277_vm1, nan, %v709_v39  ;;  %v1012_v42 = vadd.s32 3, %v4202_v50  ;;  %v1116_v44 = vadd.s32 3, %v4206_v25  ;;  %v3383_v14 = vld [vmem:[#allocation2 + $0x14c] ss:$16 sps:$4 sm:$0xff]  }
 0x139   :  { %v1807_v33 = vsub.s32 32, %v1806_v45  ;;  %v1811_v34 = vsub.s32 4294967266, %v1806_v45  ;;  %816 = vmatpush1.bf16.msra.mxu0 %v3354_v38  ;;  %859 = vmatpush1.bf16.msra.mxu1 %v3357_v61  ;;  %v4210_v36 = vpop.eup %3502  ;;  %v1808_v48 = vshll.u32 %v4154_v60, %v1806_v45  ;;  %v607_v2 = vsel %vm173_vm0, nan, %v606_v52  ;;  %v3386_v45 = vld [vmem:[#allocation2 + $0x164] ss:$16 sps:$4 sm:$0xff]  }
 0x13a   :  { %817 = vmatprep.subr.bf16.mxu0 %v3362_v63  ;;  %860 = vmatprep.subr.bf16.mxu1 %v3365_v19  ;;  %v727_v41 = vpack.c.bf16 %v710_v58, %v607_v2  ;;  %vm1934_vm13 = vcmp.lt.s32.totalorder %v1933_v51, 2  ;;  %vm1938_vm1 = vcmp.eq.s32.totalorder %v1933_v51, 2  ;;  %vm2338_vm6 = vcmp.eq.s32.totalorder %v2333_v22, 2  ;;  %v3378_v63 = vld [vmem:[#allocation2 + $0x140] ss:$16 sps:$4 sm:$0xff]  }
 0x13b   :  { %v3505_v1 = vpop.eup %3504  ;;  %v1809_v53 = vshrl.u32 %v4120_v59, %v1807_v33  ;;  %v1812_v26 = vadd.s32 127, %v1811_v34  ;;  %vm1935_vm0 = vcmp.eq.s32.totalorder %v1933_v51, 0  ;;  %vm2335_vm7 = vcmp.eq.s32.totalorder %v2333_v22, 0  ;;  %v3381_v51 = vld [vmem:[#allocation2 + $0x148] ss:$16 sps:$4 sm:$0xff]  }
 0x13c   :  { %v3507_v28 = vpop.eup %3506  ;;  %v1939_v4 = vxor.u32 2147483648, %v3505_v1  ;;  %vm2334_vm8 = vcmp.lt.s32.totalorder %v2333_v22, 2  ;;  %v1117_v12 = vand.u32 3, %v1116_v44  ;;  %v1013_v20 = vand.u32 3, %v1012_v42  ;;  %v3389_v33 = vld [vmem:[#allocation2 + $0x16c] ss:$16 sps:$4 sm:$0xff]  }
 0x13d   :  { %v4218_v46 = vpop.eup %3508  ;;  %v1810_v23 = vor.u32 %v1809_v53, %v1808_v48  ;;  %v1813_v55 = vshll.u32 %v1812_v26, 23  ;;  %818 = vmatpush1.bf16.msra.mxu0 %v3360_v30  ;;  %861 = vmatpush1.bf16.msra.mxu1 %v3363_v29  ;;  %v1936_v60 = vxor.u32 2147483648, %v3507_v28  ;;  %v1821_v49 = vsub.s32 4, %v4142_v9  ;;  %v3395_v48 = vld [vmem:[#allocation2 + $0x18c] ss:$16 sps:$4 sm:$0xff]  }
 0x13e   :  { %v4220_v59 = vpop.eup %3510  ;;  %1227 = vmatprep.subr.bf16.mxu0 %v3368_v21  ;;  %1270 = vmatprep.subr.bf16.mxu1 %v3371_v40  ;;  %v1940_v31 = vsel %vm1938_vm1, %v1939_v4, %v3507_v28  ;;  %v2340_v24 = vsel %vm2338_vm6, %v1939_v4, %v3507_v28  ;;  %v1123_v47 = vxor.u32 2147483648, %v4218_v46  ;;  %v1019_v39 = vxor.u32 2147483648, %v4210_v36  ;;  %v3387_v21 = vld [vmem:[#allocation2 + $0x168] ss:$16 sps:$4 sm:$0xff]  }
 0x13f   :  { %v1814_v8 = vor.u32 4788187, %v1813_v55  ;;  %v1937_v5 = vsel %vm1935_vm0, %v3505_v1, %v1936_v60  ;;  %v2337_v35 = vsel %vm2335_vm7, %v3505_v1, %v1936_v60  ;;  %v4223_v43 = vpop.eup %3512  ;;  %v1817_v7 = vcvt.s32.f32 %v1810_v23  ;;  %v3392_v1 = vld [vmem:[#allocation2 + $0x184] ss:$16 sps:$4 sm:$0xff]   ;;  %v3401_v55 = vld [vmem:[#allocation2 + $0x1ac] ss:$16 sps:$4 sm:$0xff]  }
 0x140   :  { %3037 = vmatmul.mubr.msk.bf16.vlgmr.msra.gmra.mrb[0].mxu0 %vm386_vm9, %v727_v41  ;;  %3038 = vmatmul.mubr.msk.bf16.vlgmr.msra.gmra.mrb[0].mxu1 %vm386_vm9, %v727_v41  ;;  %v4228_v62 = vsel %vm1934_vm13, %v1937_v5, %v1940_v31  ;;  %v4230_v27 = vsel %vm2334_vm8, %v2337_v35, %v2340_v24  ;;  %v1120_v17 = vxor.u32 2147483648, %v4220_v59  ;;  %v1016_v61 = vxor.u32 2147483648, %v4223_v43  ;;  %v3390_v41 = vld [vmem:[#allocation2 + $0x180] ss:$16 sps:$4 sm:$0xff]   ;;  %v3398_v23 = vld [vmem:[#allocation2 + $0x1a4] ss:$16 sps:$4 sm:$0xff]  }
 0x141   :  { %v1815_v37 = vand.u32 2147483647, %v1814_v8  ;;  %1228 = vmatpush1.bf16.msra.mxu0 %v3366_v6  ;;  %1271 = vmatpush1.bf16.msra.mxu1 %v3369_v54  ;;  %vm1119_vm10 = vcmp.eq.s32.totalorder %v1117_v12, 0  ;;  %vm1122_vm12 = vcmp.eq.s32.totalorder %v1117_v12, 2  ;;  %vm1737_vm15 = vcmp.lt.s32.totalorder %v3958_v32, 0 }
 0x142   :  { %1229 = vmatprep.subr.bf16.mxu0 %v3374_v11  ;;  %1272 = vmatprep.subr.bf16.mxu1 %v3377_v57  ;;  %v1121_v52 = vsel %vm1119_vm10, %v4218_v46, %v1120_v17  ;;  %v1124_v30 = vsel %vm1122_vm12, %v1123_v47, %v4220_v59  ;;  %vm1736_vm2 = vcmp.le.f32.partialorder %v1735_v3, 0.7853982  ;;  %v1822_v22 = vsel %vm1737_vm15, %v1821_v49, %v4142_v9  ;;  %v3384_v9 = vld [vmem:[#allocation2 + $0x160] ss:$16 sps:$4 sm:$0xff]   ;;  %v3393_v6 = vld [vmem:[#allocation2 + $0x188] ss:$16 sps:$4 sm:$0xff]  }
 0x143   :  { %v1818_v38 = vmul.f32 %v1817_v7, %v1815_v37  ;;  %1259 = vmatprep.mubr.bf16.mxu0 %v3628_v0  ;;  %1302 = vmatprep.mubr.bf16.mxu1 %v3628_v0  ;;  %vm1015_vm11 = vcmp.eq.s32.totalorder %v1013_v20, 0  ;;  %vm1018_vm14 = vcmp.eq.s32.totalorder %v1013_v20, 2  ;;  %vm1118_vm3 = vcmp.lt.s32.totalorder %v1117_v12, 2  ;;  %v3396_v11 = vld [vmem:[#allocation2 + $0x1a0] ss:$16 sps:$4 sm:$0xff]  }
 0x144   :  { %v1017_v58 = vsel %vm1015_vm11, %v4210_v36, %v1016_v61  ;;  %v1020_v29 = vsel %vm1018_vm14, %v1019_v39, %v4223_v43  ;;  %v1125_v3 = vsel %vm1118_vm3, %v1121_v52, %v1124_v30  ;;  %v1824_v44 = vsel %vm1736_vm2, 0, %v1822_v22  ;;  %v3399_v57 = vld [vmem:[#allocation2 + $0x1a8] ss:$16 sps:$4 sm:$0xff]   ;;  %v3404_v31 = vld [vmem:[#allocation2 + $0x1c4] ss:$16 sps:$4 sm:$0xff]  }
 0x145   :  { %v1819_v19 = vxor.u32 2147483648, %v1818_v38  ;;  %1230 = vmatpush1.bf16.msra.mxu0 %v3372_v16  ;;  %1273 = vmatpush1.bf16.msra.mxu1 %v3375_v15  ;;  %vm1014_vm4 = vcmp.lt.s32.totalorder %v1013_v20, 2  ;;  %vm1115_vm5 = vweird.f32 %v3745_v18  ;;  %vm1011_vm13 = vweird.f32 %v3735_v10  ;;  %v3407_v24 = vld [vmem:[#allocation2 + $0x1cc] ss:$16 sps:$4 sm:$0xff]   ;;  %v3402_v12 = vld [vmem:[#allocation2 + $0x1c0] ss:$16 sps:$4 sm:$0xff]  }
 0x146   :  { %1231 = vmatprep.subr.bf16.mxu0 %v3380_v56  ;;  %1274 = vmatprep.subr.bf16.mxu1 %v3383_v14  ;;  %v1021_v40 = vsel %vm1014_vm4, %v1017_v58, %v1020_v29  ;;  %v1126_v53 = vsel %vm1115_vm5, nan, %v1125_v3  ;;  %v1828_v26 = vadd.s32 3, %v1824_v44  ;;  %v4261_v2 = vand.u32 3, %v4202_v50  ;;  %v3405_v15 = vld [vmem:[#allocation2 + $0x1c8] ss:$16 sps:$4 sm:$0xff]  }
 0x147   :  { %v1820_v34 = vsel %vm1737_vm15, %v1819_v19, %v1818_v38  ;;  %v1022_v28 = vsel %vm1011_vm13, nan, %v1021_v40  ;;  %v1517_v54 = vand.u32 3, %v4206_v25  ;;  %v2230_v50 = vand.u32 3, %v1824_v44  ;;  %v3413_v20 = vld [vmem:[#allocation2 + $0x1ec] ss:$16 sps:$4 sm:$0xff]  }
 0x148   :  { %v1823_v42 = vsel %vm1736_vm2, %v3958_v32, %v1820_v34  ;;  %v1143_v4 = vpack.c.bf16 %v1126_v53, %v1022_v28  ;;  %v1829_v60 = vand.u32 3, %v1828_v26  ;;  %vm1416_vm1 = vcmp.eq.s32.totalorder %v4261_v2, 0  ;;  %v3408_v14 = vld [vmem:[#allocation2 + $0x1e0] ss:$16 sps:$4 sm:$0xff]   ;;  %v3422_v58 = vld [vmem:[#allocation2 + $0x224] ss:$16 sps:$4 sm:$0xff]  }
 0x149   :  { %3514 = vcosq.f32 %v1823_v42  ;;  %1232 = vmatpush1.bf16.msra.mxu0 %v3378_v63  ;;  %1275 = vmatpush1.bf16.msra.mxu1 %v3381_v51  ;;  %vm1931_vm6 = vweird.f32 %v3903_v13  ;;  %v1418_v25 = vsel %vm1416_vm1, %v4210_v36, %v1016_v61  ;;  %vm1419_vm0 = vcmp.eq.s32.totalorder %v4261_v2, 2  ;;  %v3411_v63 = vld [vmem:[#allocation2 + $0x1e8] ss:$16 sps:$4 sm:$0xff]   ;;  %v3416_v13 = vld [vmem:[#allocation2 + $0x204] ss:$16 sps:$4 sm:$0xff]  }
 0x14a   :  { %3516 = vsinq.f32 %v1823_v42  ;;  %1233 = vmatprep.subr.bf16.mxu0 %v3386_v45  ;;  %1276 = vmatprep.subr.bf16.mxu1 %v3389_v33  ;;  %v1421_v5 = vsel %vm1419_vm0, %v1019_v39, %v4223_v43  ;;  %vm1518_vm7 = vcmp.lt.s32.totalorder %v1517_v54, 2  ;;  %vm1519_vm8 = vcmp.eq.s32.totalorder %v1517_v54, 0  ;;  %v3410_v43 = vld [vmem:[#allocation2 + $0x1e4] ss:$16 sps:$4 sm:$0xff]   ;;  %v3414_v22 = vld [vmem:[#allocation2 + $0x200] ss:$16 sps:$4 sm:$0xff]  }
 0x14b   :  { %vm1522_vm10 = vcmp.eq.s32.totalorder %v1517_v54, 2  ;;  %v1521_v16 = vsel %vm1519_vm8, %v4218_v46, %v1120_v17  ;;  %vm1830_vm12 = vcmp.lt.s32.totalorder %v1829_v60, 2  ;;  %vm1831_vm15 = vcmp.eq.s32.totalorder %v1829_v60, 0  ;;  %v3417_v33 = vld [vmem:[#allocation2 + $0x208] ss:$16 sps:$4 sm:$0xff]  }
 0x14c   :  { %v1524_v37 = vsel %vm1522_vm10, %v1123_v47, %v4220_v59  ;;  %vm1834_vm2 = vcmp.eq.s32.totalorder %v1829_v60, 2  ;;  %vm2235_vm11 = vcmp.eq.s32.totalorder %v2230_v50, 2  ;;  %vm2231_vm14 = vcmp.lt.s32.totalorder %v2230_v50, 2  ;;  %v3425_v29 = vld [vmem:[#allocation2 + $0x22c] ss:$16 sps:$4 sm:$0xff]  }
 0x14d   :  { %1234 = vmatpush1.bf16.msra.mxu0 %v3384_v9  ;;  %1277 = vmatpush1.bf16.msra.mxu1 %v3387_v21  ;;  %vm2232_vm3 = vcmp.eq.s32.totalorder %v2230_v50, 0  ;;  %v1942_v46 = vsel %vm1931_vm6, nan, %v4228_v62  ;;  %v2342_v47 = vsel %vm1931_vm6, nan, %v4230_v27  ;;  %vm1827_vm4 = vweird.f32 %v3958_v32  ;;  %v3419_v27 = vld [vmem:[#allocation2 + $0x20c] ss:$16 sps:$4 sm:$0xff]  }
 0x14e   :  { %1627 = vmatprep.subr.bf16.mxu0 %v3392_v1  ;;  %1670 = vmatprep.subr.bf16.mxu1 %v3395_v48  ;;  %v1525_v38 = vsel %vm1518_vm7, %v1521_v16, %v1524_v37  ;;  %vm1415_vm1 = vcmp.lt.s32.totalorder %v4261_v2, 2  ;;  %v3420_v18 = vld [vmem:[#allocation2 + $0x220] ss:$16 sps:$4 sm:$0xff]   ;;  %v3423_v42 = vld [vmem:[#allocation2 + $0x228] ss:$16 sps:$4 sm:$0xff]  }
 0x14f   :  { %v1422_v51 = vsel %vm1415_vm1, %v1418_v25, %v1421_v5  ;;  %v1526_v52 = vsel %vm1115_vm5, nan, %v1525_v38  ;;  %v3428_v3 = vld [vmem:[#allocation2 + $0x244] ss:$16 sps:$4 sm:$0xff]   ;;  %v3431_v10 = vld [vmem:[#allocation2 + $0x24c] ss:$16 sps:$4 sm:$0xff]  }
 0x150   :  { %3063 = vmatmul.mubr.msk.bf16.vlgmr.msra.gmra.mrb[0].mxu0 %vm386_vm9, %v1143_v4  ;;  %3064 = vmatmul.mubr.msk.bf16.vlgmr.msra.gmra.mrb[0].mxu1 %vm386_vm9, %v1143_v4  ;;  %v1423_v30 = vsel %vm1011_vm13, nan, %v1422_v51  ;;  %v3426_v44 = vld [vmem:[#allocation2 + $0x240] ss:$16 sps:$4 sm:$0xff]   ;;  %v3429_v9 = vld [vmem:[#allocation2 + $0x248] ss:$16 sps:$4 sm:$0xff]  }
 0x151   :  { %1628 = vmatpush1.bf16.msra.mxu0 %v3390_v41  ;;  %1671 = vmatpush1.bf16.msra.mxu1 %v3393_v6  ;;  %v1543_v34 = vpack.c.bf16 %v1526_v52, %v1423_v30  ;;  %v3434_v21 = vld [vmem:[#allocation2 + $0x264] ss:$16 sps:$4 sm:$0xff]   ;;  %v3437_v40 = vld [vmem:[#allocation2 + $0x26c] ss:$16 sps:$4 sm:$0xff]   ;;  %v3432_v1 = vld [vmem:[#allocation2 + $0x260] ss:$16 sps:$4 sm:$0xff]   ;;  %v477_v30 = vlaneseq }
 0x152   :  { %1629 = vmatprep.subr.bf16.mxu0 %v3398_v23  ;;  %1672 = vmatprep.subr.bf16.mxu1 %v3401_v55  ;;  %v3435_v48 = vld [vmem:[#allocation2 + $0x268] ss:$16 sps:$4 sm:$0xff]   ;;  %v3440_v53 = vld [vmem:[#allocation2 + $0x284] ss:$16 sps:$4 sm:$0xff]   ;;  %v3443_v26 = vld [vmem:[#allocation2 + $0x28c] ss:$16 sps:$4 sm:$0xff]  }
 0x153   :  { %v3515_v8 = vpop.eup %3514  ;;  %1659 = vmatprep.mubr.bf16.mxu0 %v3628_v0  ;;  %1702 = vmatprep.mubr.bf16.mxu1 %v3628_v0  ;;  %v3438_v2 = vld [vmem:[#allocation2 + $0x280] ss:$16 sps:$4 sm:$0xff]   ;;  %v3441_v28 = vld [vmem:[#allocation2 + $0x288] ss:$16 sps:$4 sm:$0xff]   ;;  %v3446_v41 = vld [vmem:[#allocation2 + $0x2a4] ss:$16 sps:$4 sm:$0xff]  }
 0x154   :  { %v3517_v35 = vpop.eup %3516  ;;  %v1835_v7 = vxor.u32 2147483648, %v3515_v8  ;;  %v3449_v6 = vld [vmem:[#allocation2 + $0x2ac] ss:$16 sps:$4 sm:$0xff]   ;;  %v3444_v4 = vld [vmem:[#allocation2 + $0x2a0] ss:$16 sps:$4 sm:$0xff]  }
 0x155   :  { %1630 = vmatpush1.bf16.msra.mxu0 %v3396_v11  ;;  %1673 = vmatpush1.bf16.msra.mxu1 %v3399_v57  ;;  %v1832_v36 = vxor.u32 2147483648, %v3517_v35  ;;  %v3447_v23 = vld [vmem:[#allocation2 + $0x2a8] ss:$16 sps:$4 sm:$0xff]   ;;  %v3452_v55 = vld [vmem:[#allocation2 + $0x2c4] ss:$16 sps:$4 sm:$0xff]  }
 0x156   :  { %1631 = vmatprep.subr.bf16.mxu0 %v3404_v31  ;;  %1674 = vmatprep.subr.bf16.mxu1 %v3407_v24  ;;  %v1836_v49 = vsel %vm1834_vm2, %v1835_v7, %v3517_v35  ;;  %v2237_v17 = vsel %vm2235_vm11, %v1835_v7, %v3517_v35  ;;  %v3455_v54 = vld [vmem:[#allocation2 + $0x2cc] ss:$16 sps:$4 sm:$0xff]   ;;  %v3450_v60 = vld [vmem:[#allocation2 + $0x2c0] ss:$16 sps:$4 sm:$0xff]   ;;  %v3453_v50 = vld [vmem:[#allocation2 + $0x2c8] ss:$16 sps:$4 sm:$0xff]  }
 0x157   :  { %v1833_v56 = vsel %vm1831_vm15, %v3515_v8, %v1832_v36  ;;  %v2234_v59 = vsel %vm2232_vm3, %v3515_v8, %v1832_v36  ;;  %v3458_v11 = vld [vmem:[#allocation2 + $0x2e4] ss:$16 sps:$4 sm:$0xff]   ;;  %v3461_v57 = vld [vmem:[#allocation2 + $0x2ec] ss:$16 sps:$4 sm:$0xff]   ;;  %v3456_v31 = vld [vmem:[#allocation2 + $0x2e0] ss:$16 sps:$4 sm:$0xff]  }
 0x158   :  { %v1837_v61 = vsel %vm1830_vm12, %v1833_v56, %v1836_v49  ;;  %v2238_v39 = vsel %vm2231_vm14, %v2234_v59, %v2237_v17  ;;  %v3459_v24 = vld [vmem:[#allocation2 + $0x2e8] ss:$16 sps:$4 sm:$0xff]   ;;  %v3463_v25 = vld [vmem:[#allocation5 + $0xc0] sm:$0xff]   ;;  %v3470_v7 = vld [vmem:[#allocation5 + $0x50] sm:$0xff]  }
 0x159   :  { %1632 = vmatpush1.bf16.msra.mxu0 %v3402_v12  ;;  %1675 = vmatpush1.bf16.msra.mxu1 %v3405_v15  ;;  %v1838_v19 = vsel %vm1827_vm4, nan, %v1837_v61  ;;  %v2239_v62 = vsel %vm1827_vm4, nan, %v2238_v39  ;;  %v3464_v8 = vld [vmem:[#allocation5] sm:$0xff]   ;;  %v3466_v35 = vld [vmem:[#allocation5 + $0x48] sm:$0xff]   ;;  %v3471_v15 = vld [vmem:[#allocation5 + $0xd0] sm:$0xff]  }
 0x15a   :  { %1633 = vmatprep.subr.bf16.mxu0 %v3410_v43  ;;  %1676 = vmatprep.subr.bf16.mxu1 %v3413_v20  ;;  %v1959_v45 = vpack.c.bf16 %v1942_v46, %v1838_v19  ;;  %v4295_v32 = vpack.c.bf16 %v2342_v47, %v2239_v62  ;;  %v3465_v5 = vld [vmem:[#allocation5 + $0x80] sm:$0xff]   ;;  %v3467_v12 = vld [vmem:[#allocation5 + $0xc8] sm:$0xff]   ;;  %v3472_v36 = vld [vmem:[#allocation5 + $0x10] sm:$0xff]  }
 0x15b   :  { %v3468_v16 = vld [vmem:[#allocation5 + $0x8] sm:$0xff]   ;;  %v3473_v43 = vld [vmem:[#allocation5 + $0x90] sm:$0xff]   ;;  %v3474_v20 = vld [vmem:[#allocation5 + $0x58] sm:$0xff]  }
 0x15c   :  { %v3469_v37 = vld [vmem:[#allocation5 + $0x88] sm:$0xff]   ;;  %v3475_v49 = vld [vmem:[#allocation5 + $0xd8] sm:$0xff]   ;;  %v3478_v46 = vld [vmem:[#allocation5 + $0x60] sm:$0xff]  }
 0x15d   :  { %1634 = vmatpush1.bf16.msra.mxu0 %v3408_v14  ;;  %1677 = vmatpush1.bf16.msra.mxu1 %v3411_v63  ;;  %v3476_v17 = vld [vmem:[#allocation5 + $0x18] sm:$0xff]   ;;  %v3479_v59 = vld [vmem:[#allocation5 + $0xe0] sm:$0xff]   ;;  %v3482_v38 = vld [vmem:[#allocation5 + $0x68] sm:$0xff]  }
 0x15e   :  { %2043 = vmatprep.subr.bf16.mxu0 %v3416_v13  ;;  %2086 = vmatprep.subr.bf16.mxu1 %v3419_v27  ;;  %v3477_v56 = vld [vmem:[#allocation5 + $0x98] sm:$0xff]   ;;  %v3480_v47 = vld [vmem:[#allocation5 + $0x20] sm:$0xff]   ;;  %v3483_v61 = vld [vmem:[#allocation5 + $0xe8] sm:$0xff]  }
 0x15f   :  { %v3481_v14 = vld [vmem:[#allocation5 + $0xa0] sm:$0xff]   ;;  %v3484_v39 = vld [vmem:[#allocation5 + $0x28] sm:$0xff]   ;;  %v3486_v19 = vld [vmem:[#allocation5 + $0x70] sm:$0xff]  }
 0x160   :  { %3089 = vmatmul.mubr.msk.bf16.vlgmr.msra.gmra.mrb[0].mxu0 %vm386_vm9, %v1543_v34  ;;  %3090 = vmatmul.mubr.msk.bf16.vlgmr.msra.gmra.mrb[0].mxu1 %vm386_vm9, %v1543_v34  ;;  %v3485_v63 = vld [vmem:[#allocation5 + $0xa8] sm:$0xff]   ;;  %v3487_v62 = vld [vmem:[#allocation5 + $0xf0] sm:$0xff]   ;;  %v3490_v27 = vld [vmem:[#allocation5 + $0x78] sm:$0xff]  }
 0x161   :  { %2044 = vmatpush1.bf16.msra.mxu0 %v3414_v22  ;;  %2087 = vmatpush1.bf16.msra.mxu1 %v3417_v33  ;;  %v3488_v51 = vld [vmem:[#allocation5 + $0x30] sm:$0xff]   ;;  %v3493_v52 = vld [vmem:[#allocation5 + $0xb8] sm:$0xff]   ;;  %v478_v22 = vshrl.u32 %v477_v30, 7 }
 0x162   :  { %2045 = vmatprep.subr.bf16.mxu0 %v3422_v58  ;;  %2088 = vmatprep.subr.bf16.mxu1 %v3425_v29  ;;  %v3489_v13 = vld [vmem:[#allocation5 + $0xb0] sm:$0xff]   ;;  %v60_v58 = vld [vmem:[%s4368_s5] sm:$0xf]  ;;  %s3635_s5 = smov [#allocation7]  }
 0x163   :  { %2075 = vmatprep.mubr.bf16.mxu0 %v3628_v0  ;;  %2118 = vmatprep.mubr.bf16.mxu1 %v3628_v0  ;;  %v479_v33 = vsub.s32 0, %v478_v22  ;;  %v487_v34 = vsub.s32 2, %v478_v22  ;;  %v483_v29 = vsub.s32 1, %v478_v22  ;;  %s2973_s23 = sshll.u32 %s3635_s5, 4  ;;  %s2974_s23 = int_to_ptr.vmem [resolvable:$true] %s2973_s23 }
 0x164   :  { %p3599_p3 = scmp.lt.s32.totalorder %s2974_s23, %s2974_s23 }
 0x165   :  { %2046 = vmatpush1.bf16.msra.mxu0 %v3420_v18  ;;  %2089 = vmatpush1.bf16.msra.mxu1 %v3423_v42  ;;  %v491_v18 = vsub.s32 3, %v478_v22  ;;  %v480_v42 = vrot.slane %v60_v58, %v479_v33 }
 0x166   :  { %2047 = vmatprep.subr.bf16.mxu0 %v3428_v3  ;;  %2090 = vmatprep.subr.bf16.mxu1 %v3431_v10  ;;  %v488_v3 = vrot.slane %v60_v58, %v487_v34  ;;  %v484_v10 = vrot.slane %v60_v58, %v483_v29 }
 0x169   :  { %2048 = vmatpush1.bf16.msra.mxu0 %v3426_v44  ;;  %2091 = vmatpush1.bf16.msra.mxu1 %v3429_v9  ;;  %v492_v44 = vrot.slane %v60_v58, %v491_v18 }
 0x16a   :  { %2049 = vmatprep.subr.bf16.mxu0 %v3434_v21  ;;  %2092 = vmatprep.subr.bf16.mxu1 %v3437_v40 }
 0x16d   :  { %2050 = vmatpush1.bf16.msra.mxu0 %v3432_v1  ;;  %2093 = vmatpush1.bf16.msra.mxu1 %v3435_v48 }
 0x16e   :  { %2443 = vmatprep.subr.bf16.mxu0 %v3440_v53  ;;  %2486 = vmatprep.subr.bf16.mxu1 %v3443_v26 }
 0x170   :  { %3115 = vmatmul.mubr.msk.bf16.vlgmr.msra.gmra.mrb[0].mxu0 %vm386_vm9, %v1959_v45  ;;  %3116 = vmatmul.mubr.msk.bf16.vlgmr.msra.gmra.mrb[0].mxu1 %vm386_vm9, %v1959_v45  ;;  %v3491_v45 = vld [vmem:[#allocation5 + $0xf8] sm:$0xff]  }
 0x171   :  { %2444 = vmatpush1.bf16.msra.mxu0 %v3438_v2  ;;  %2487 = vmatpush1.bf16.msra.mxu1 %v3441_v28 }
 0x172   :  { %2445 = vmatprep.subr.bf16.mxu0 %v3446_v41  ;;  %2488 = vmatprep.subr.bf16.mxu1 %v3449_v6 }
 0x173   :  { %2475 = vmatprep.mubr.bf16.mxu0 %v3628_v0  ;;  %2518 = vmatprep.mubr.bf16.mxu1 %v3628_v0  ;;  %v3462_v0 = vld [vmem:[#allocation5 + $0x40] sm:$0xff]  }
 0x175   :  { %2446 = vmatpush1.bf16.msra.mxu0 %v3444_v4  ;;  %2489 = vmatpush1.bf16.msra.mxu1 %v3447_v23 }
 0x176   :  { %2447 = vmatprep.subr.bf16.mxu0 %v3452_v55  ;;  %2490 = vmatprep.subr.bf16.mxu1 %v3455_v54 }
 0x179   :  { %2448 = vmatpush1.bf16.msra.mxu0 %v3450_v60  ;;  %2491 = vmatpush1.bf16.msra.mxu1 %v3453_v50 }
 0x17a   :  { %2449 = vmatprep.subr.bf16.mxu0 %v3458_v11  ;;  %2492 = vmatprep.subr.bf16.mxu1 %v3461_v57 }
 0x17d   :  { %2450 = vmatpush1.bf16.msra.mxu0 %v3456_v31  ;;  %2493 = vmatpush1.bf16.msra.mxu1 %v3459_v24 }
 0x17e   :  { %3184 = vmatprep.subr.bf16.mxu0 %v3462_v0  ;;  %3206 = vmatprep.subr.bf16.mxu1 %v3463_v25 }
 0x180   :  { %3141 = vmatmul.mubr.msk.bf16.vlgmr.msra.gmra.mrb[0].mxu0 %vm386_vm9, %v4295_v32  ;;  %3142 = vmatmul.mubr.msk.bf16.vlgmr.msra.gmra.mrb[0].mxu1 %vm386_vm9, %v4295_v32  ;;  %v3492_v32 = vld [vmem:[#allocation5 + $0x38] sm:$0xff]  }
 0x181   :  { %3185 = vmatpush3.bf16.msra.mxu0 %v3464_v8  ;;  %3207 = vmatpush3.bf16.msra.mxu1 %v3465_v5 }
 0x182   :  { %3186 = vmatprep.subr.bf16.mxu0 %v3466_v35  ;;  %3208 = vmatprep.subr.bf16.mxu1 %v3467_v12 }
 0x185   :  { %3187 = vmatpush3.bf16.msra.mxu0 %v3468_v16  ;;  %3209 = vmatpush3.bf16.msra.mxu1 %v3469_v37 }
 0x186   :  { %3188 = vmatprep.subr.bf16.mxu0 %v3470_v7  ;;  %3210 = vmatprep.subr.bf16.mxu1 %v3471_v15 }
 0x189   :  { %3189 = vmatpush3.bf16.msra.mxu0 %v3472_v36  ;;  %3211 = vmatpush3.bf16.msra.mxu1 %v3473_v43 }
 0x18a   :  { %3190 = vmatprep.subr.bf16.mxu0 %v3474_v20  ;;  %3212 = vmatprep.subr.bf16.mxu1 %v3475_v49 }
 0x18d   :  { %3191 = vmatpush3.bf16.msra.mxu0 %v3476_v17  ;;  %3213 = vmatpush3.bf16.msra.mxu1 %v3477_v56 }
 0x18e   :  { %3192 = vmatprep.subr.bf16.mxu0 %v3478_v46  ;;  %3214 = vmatprep.subr.bf16.mxu1 %v3479_v59 }
 0x191   :  { %3193 = vmatpush3.bf16.msra.mxu0 %v3480_v47  ;;  %3215 = vmatpush3.bf16.msra.mxu1 %v3481_v14 }
 0x192   :  { %3194 = vmatprep.subr.bf16.mxu0 %v3482_v38  ;;  %3216 = vmatprep.subr.bf16.mxu1 %v3483_v61 }
 0x195   :  { %3195 = vmatpush3.bf16.msra.mxu0 %v3484_v39  ;;  %3217 = vmatpush3.bf16.msra.mxu1 %v3485_v63 }
 0x196   :  { %3196 = vmatprep.subr.bf16.mxu0 %v3486_v19  ;;  %3218 = vmatprep.subr.bf16.mxu1 %v3487_v62 }
 0x199   :  { %3197 = vmatpush3.bf16.msra.mxu0 %v3488_v51  ;;  %3219 = vmatpush3.bf16.msra.mxu1 %v3489_v13 }
 0x19a   :  { %3198 = vmatprep.subr.bf16.mxu0 %v3490_v27  ;;  %3220 = vmatprep.subr.bf16.mxu1 %v3491_v45 }
 0x19d   :  { %3199 = vmatpush3.bf16.msra.mxu0 %v3492_v32  ;;  %3221 = vmatpush3.bf16.msra.mxu1 %v3493_v52 }
 0x253   :  { %v2477_v9 = vpop.f32.mrb[0].mxu0  ;;  %v2520_v21 = vpop.f32.mrb[0].mxu1 }
 0x254   :  { %v4316_v40 = vadd.f32 %v2477_v9, %v480_v42  ;;  %v4318_v1 = vadd.f32 %v2520_v21, %v488_v3  ;;  %v2479_v48 = vpop.f32.mrb[1].mxu0  ;;  %v2522_v53 = vpop.f32.mrb[1].mxu1 }
 0x255   :  { %v4320_v26 = vadd.f32 %v2479_v48, %v484_v10  ;;  %v4322_v2 = vadd.f32 %v2522_v53, %v492_v44  ;;  %v2481_v28 = vpop.f32.mrb[2].mxu0  ;;  %v2524_v41 = vpop.f32.mrb[2].mxu1 }
 0x256   :  { %v2537_v6 = vmin.f32 %v4316_v40, 20.0  ;;  %v2539_v4 = vmin.f32 %v4318_v1, 20.0  ;;  %v4326_v23 = vadd.f32 %v2481_v28, %v480_v42  ;;  %v4328_v55 = vadd.f32 %v2524_v41, %v488_v3  ;;  %v2483_v54 = vpop.f32.mrb[3].mxu0  ;;  %v2526_v60 = vpop.f32.mrb[3].mxu1 }
 0x257   :  { %v2538_v50 = vmin.f32 %v4320_v26, 20.0  ;;  %v2540_v11 = vmin.f32 %v4322_v2, 20.0  ;;  %v4332_v57 = vadd.f32 %v2483_v54, %v484_v10  ;;  %v4334_v31 = vadd.f32 %v2526_v60, %v492_v44 }
 0x258   :  { %v2545_v24 = vmul.f32 1.442695, %v2537_v6  ;;  %v2549_v0 = vmul.f32 1.442695, %v2539_v4  ;;  %v2541_v25 = vmin.f32 %v4326_v23, 20.0  ;;  %v2543_v8 = vmin.f32 %v4328_v55, 20.0 }
 0x259   :  { %v2547_v5 = vmul.f32 1.442695, %v2538_v50  ;;  %v2551_v35 = vmul.f32 1.442695, %v2540_v11  ;;  %v2542_v12 = vmin.f32 %v4332_v57, 20.0  ;;  %v2544_v16 = vmin.f32 %v4334_v31, 20.0 }
 0x25a   :  { %3518 = vpow2.f32 %v2545_v24  ;;  %v2553_v37 = vmul.f32 1.442695, %v2541_v25  ;;  %v2557_v7 = vmul.f32 1.442695, %v2543_v8 }
 0x25b   :  { %3520 = vpow2.f32 %v2549_v0  ;;  %v2555_v15 = vmul.f32 1.442695, %v2542_v12  ;;  %v2559_v36 = vmul.f32 1.442695, %v2544_v16 }
 0x25c   :  { %3522 = vpow2.f32 %v2547_v5 }
 0x25d   :  { %3524 = vpow2.f32 %v2551_v35 }
 0x25e   :  { %3526 = vpow2.f32 %v2553_v37 }
 0x25f   :  { %3528 = vpow2.f32 %v2557_v7 }
 0x260   :  { %3530 = vpow2.f32 %v2555_v15 }
 0x261   :  { %3532 = vpow2.f32 %v2559_v36 }
 0x264   :  { %v3519_v43 = vpop.eup %3518 }
 0x265   :  { %v3521_v20 = vpop.eup %3520  ;;  %v2561_v49 = vadd.f32 1.0, %v3519_v43 }
 0x266   :  { %v3523_v17 = vpop.eup %3522  ;;  %v2563_v56 = vadd.f32 1.0, %v3521_v20 }
 0x267   :  { %v3525_v46 = vpop.eup %3524  ;;  %v2569_v59 = vmul.f32 %v2561_v49, %v2561_v49  ;;  %v2562_v47 = vadd.f32 1.0, %v3523_v17 }
 0x268   :  { %v3527_v14 = vpop.eup %3526  ;;  %v2571_v38 = vmul.f32 %v2563_v56, %v2563_v56  ;;  %v2564_v61 = vadd.f32 1.0, %v3525_v46 }
 0x269   :  { %v3529_v39 = vpop.eup %3528  ;;  %v2585_v63 = vadd.f32 1.0, %v2569_v59  ;;  %v2570_v19 = vmul.f32 %v2562_v47, %v2562_v47  ;;  %v2565_v62 = vadd.f32 1.0, %v3527_v14  ;;  %v3143_v48 = vadd.f32 -1.0, %v2569_v59 }
 0x26a   :  { %v3531_v51 = vpop.eup %3530  ;;  %v2587_v13 = vadd.f32 1.0, %v2571_v38  ;;  %v2572_v27 = vmul.f32 %v2564_v61, %v2564_v61  ;;  %v2567_v45 = vadd.f32 1.0, %v3529_v39  ;;  %v3145_v28 = vadd.f32 -1.0, %v2571_v38  ;;  %v3151_v61 = vld [vmem:[%s4370_s7] ss:$0 sm:$0xff]  ;;  %s3594_s7 = scalar_lea.vmem %s2974_s23, 256 }
 0x26b   :  { %v3533_v32 = vpop.eup %3532  ;;  %3534 = vrcp.f32 %v2585_v63  ;;  %v2586_v52 = vadd.f32 1.0, %v2570_v19  ;;  %v2573_v30 = vmul.f32 %v2565_v62, %v2565_v62  ;;  %v2566_v58 = vadd.f32 1.0, %v3531_v51  ;;  %p3595_p2 = scmp.ne.s32.totalorder %s2974_s23, %s3594_s7  ;;  %p3600_p4 = scmp.lt.s32.totalorder %s3594_s7, %s3594_s7 }
 0x26c   :  { %3536 = vrcp.f32 %v2587_v13  ;;  %v2588_v22 = vadd.f32 1.0, %v2572_v27  ;;  %v2575_v33 = vmul.f32 %v2567_v45, %v2567_v45  ;;  %v2568_v18 = vadd.f32 1.0, %v3533_v32 }
 0x26d   :  { %3538 = vrcp.f32 %v2586_v52  ;;  %v2589_v34 = vadd.f32 1.0, %v2573_v30  ;;  %v2574_v42 = vmul.f32 %v2566_v58, %v2566_v58  ;;  %v3147_v4 = vadd.f32 -1.0, %v2573_v30  ;;  %p3601_p5 = por %p3600_p4, %p3599_p3 }
 0x26e   :  { %3540 = vrcp.f32 %v2588_v22  ;;  %v2591_v29 = vadd.f32 1.0, %v2575_v33  ;;  %v2576_v3 = vmul.f32 %v2568_v18, %v2568_v18  ;;  %v3149_v50 = vadd.f32 -1.0, %v2575_v33 }
 0x26f   :  { %3542 = vrcp.f32 %v2589_v34  ;;  %v2590_v10 = vadd.f32 1.0, %v2574_v42  ;;  %v3144_v24 = vadd.f32 -1.0, %v2570_v19  ;;  %v3146_v25 = vadd.f32 -1.0, %v2572_v27  ;;  %p3602_p6 = pnand %p3601_p5, %p3595_p2 }
 0x270   :  { %3544 = vrcp.f32 %v2591_v29  ;;  %v2592_v44 = vadd.f32 1.0, %v2576_v3  ;;  %v3148_v16 = vadd.f32 -1.0, %v2574_v42  ;;  %v3150_v43 = vadd.f32 -1.0, %v2576_v3 }
 0x271   :  { %3546 = vrcp.f32 %v2590_v10 }
 0x272   :  { %3548 = vrcp.f32 %v2592_v44 }
 0x275   :  { %v3535_v9 = vpop.eup %3534 }
 0x276   :  { %v3537_v21 = vpop.eup %3536  ;;  %v2601_v6 = vmul.f32 %v3535_v9, %v3143_v48 }
 0x277   :  { %v3539_v53 = vpop.eup %3538  ;;  %v2603_v60 = vmul.f32 %v3537_v21, %v3145_v28 }
 0x278   :  { %v3541_v41 = vpop.eup %3540  ;;  %v2609_v5 = vmul.f32 %v4316_v40, %v2601_v6  ;;  %v2602_v35 = vmul.f32 %v3539_v53, %v3144_v24 }
 0x279   :  { %v3543_v54 = vpop.eup %3542  ;;  %v2611_v7 = vmul.f32 %v4318_v1, %v2603_v60  ;;  %v2604_v15 = vmul.f32 %v3541_v41, %v3146_v25 }
 0x27a   :  { %v3545_v11 = vpop.eup %3544  ;;  %v2605_v0 = vmul.f32 %v3543_v54, %v3147_v4  ;;  %v2610_v59 = vmul.f32 %v4320_v26, %v2602_v35 }
 0x27b   :  { %v2607_v8 = vmul.f32 %v3545_v11, %v3149_v50  ;;  %v3547_v37 = vpop.eup %3546  ;;  %v2612_v47 = vmul.f32 %v4322_v2, %v2604_v15 }
 0x27c   :  { %v2613_v12 = vmul.f32 %v4326_v23, %v2605_v0  ;;  %v3549_v20 = vpop.eup %3548  ;;  %v2606_v17 = vmul.f32 %v3547_v37, %v3148_v16 }
 0x27d   :  { %v2615_v36 = vmul.f32 %v4328_v55, %v2607_v8  ;;  %v2608_v46 = vmul.f32 %v3549_v20, %v3150_v43 }
 0x27e   :  { %v2617_v49 = vpack.c.bf16 %v2613_v12, %v2609_v5  ;;  %v2614_v40 = vmul.f32 %v4332_v57, %v2606_v17 }
 0x27f   :  { %v2619_v56 = vpack.c.bf16 %v2615_v36, %v2611_v7  ;;  %v2616_v23 = vmul.f32 %v4334_v31, %v2608_v46 }
 0x280   :  { %v2618_v14 = vpack.c.bf16 %v2614_v40, %v2610_v59 }
 0x281   :  { %v2620_v38 = vpack.c.bf16 %v2616_v23, %v2612_v47 }
 0x282   :  { %2916 = vmatprep.mubr.bf16.mxu0 %v2618_v14 }
 0x283   :  { %2957 = vmatprep.mubr.bf16.mxu1 %v2620_v38  ;;  %2917 = vmatmul.mubr.bf16.vlgmr.msra.gmra.mrb[4].mxu0 %v2617_v49 }
 0x284   :  { %2958 = vmatmul.mubr.bf16.vlgmr.msra.gmra.mrb[4].mxu1 %v2619_v56 }
 0x356   :  { %v3200_v1 = vpop.f32.mrb[4].mxu0 }
 0x357   :  { %v3222_v55 = vpop.f32.mrb[4].mxu1  ;;  %v3201_v39 = vpop.f32.mrb[5].mxu0 }
 0x358   :  { %v3202_v26 = vadd.f32 %v3201_v39, %v3200_v1  ;;  %v3223_v63 = vpop.f32.mrb[5].mxu1  ;;  %v3203_v57 = vpop.f32.mrb[6].mxu0 }
 0x359   :  { %v3224_v19 = vadd.f32 %v3223_v63, %v3222_v55  ;;  %v3225_v2 = vpop.f32.mrb[6].mxu1  ;;  %v3204_v62 = vpop.f32.mrb[7].mxu0 }
 0x35a   :  { %v2919_v31 = vadd.f32 %v3202_v26, %v3151_v61  ;;  %v3205_v51 = vadd.f32 %v3204_v62, %v3203_v57  ;;  %v3226_v13 = vpop.f32.mrb[7].mxu1 }
 0x35b   :  { %v3227_v27 = vadd.f32 %v3226_v13, %v3225_v2 }
 0x35c   :  { %v2960_v45 = vadd.f32 %v3224_v19, %v2919_v31  ;;  %v2922_v32 = vadd.f32 %v3205_v51, %v3151_v61 }
 0x35e   :  { %2966 = vst [vmem:[#allocation7] sm:$0xff] %v2960_v45  ;;  %v2963_v52 = vadd.f32 %v3227_v27, %v2922_v32 }
 0x360   :  { %2967 = vst [vmem:[#allocation7 + $0x8] sm:$0xff] %v2963_v52 }
 0x361   :  { %3605 = shalt.err (!%p3602_p6)
}
 0x362   :  { %s3606_s26 = scalar_lea.hbm %s4371_s8, 256 }
 0x363   :  { %p3607_p7 = scmp.ne.s32.totalorder %s4371_s8, %s3606_s26  ;;  %p3610_p8 = scmp.lt.u32.totalorder %s3606_s26, %s4371_s8 }
 0x365   :  { %p3612_p9 = pnand %p3610_p8, %p3607_p7 }
 0x367   :  { %3615 = shalt.err (!%p3612_p9)
}
 0x368   :  { %s3636_s30 = smov 128   ;;  %s3637_s9 = smov 8  }
 0x369   :  { %2979 = dma.vmem_to_hbm [thread:$0]  %s2974_s23, 256, %s4371_s8, [#allocation4], %s3636_s30, %s3636_s30, %s3637_s9  }
 0x36a   :  { %3620 = dma.done.wait [#allocation4], 256  }
 0x36b   :  { %3621 = vsyncadd [#allocation4], 4294967040 }
 0x36c   :  { %2983 = vsyncpa [#allocation3], 1 }
 0x36d   :  { %2984 = vsyncpa [#allocation6], 1 }
 0x36e   :  { %2985 = vsyncpa [#allocation4], 1 }

</bundles_post_ra>
